<compile_context>
chip_gen: v7x
topology: tpu7x:2x2x1
jax: 0.10.0
libtpu: 0.0.40
codegen_flags: <defaults>
</compile_context>

<pallas_src>
import math
from functools import partial

import jax
import jax.numpy as jnp
from jax.experimental import pallas as pl
from jax.experimental.pallas import tpu as pltpu

LANE = 128  # TPU lane width; output-channel tile size (native MXU N on v5e, fine on v6e/v7x)


def _round_up(n, m):
    return ((n + m - 1) // m) * m


def make_block_kernel(K, pool, eps):
    """Fused conv1d('same') + BN(train) + ReLU + maxpool for one 128-wide output-channel tile."""
    pad = K // 2
    apad = _round_up(pad, 8)  # 8-aligned halo region in scratch -> only aligned stores

    def kernel(x_ref, w_ref, b_ref, g_ref, be_ref, o_ref, xp_ref):
        # x_ref : (B, L, Cin_p)           lane-dense input tile (padded channels are zero)
        # w_ref : (K*Cin_p, CT)           im2col weight tile, row = k*Cin_p + c
        # b_ref, g_ref, be_ref : (1, CT)  conv bias / BN gamma / BN beta (zero in padded channels)
        # o_ref : (B, L//pool, CT)
        # xp_ref: (B, L + 2*apad, Cin_p)  VMEM scratch holding the zero-haloed input
        B, L, Cin = x_ref.shape
        CT = w_ref.shape[1]
        Lp = L // pool

        # --- in-kernel halo: zero the scratch, drop the tile at an 8-aligned offset ---
        xp_ref[...] = jnp.zeros(xp_ref.shape, jnp.float32)
        xp_ref[:, apad:apad + L, :] = x_ref[...]
        xp = xp_ref[...]

        # --- im2col -> single lane-dense MXU matmul (M = B*L, contraction = K*Cin_p) ---
        base = apad - pad
        cols = jnp.concatenate(
            [xp[:, base + k:base + k + L, :] for k in range(K)], axis=-1)  # (B, L, K*Cin)
        cols = cols.reshape(B * L, K * Cin)
        acc = jnp.dot(cols, w_ref[...], preferred_element_type=jnp.float32)  # (B*L, CT) f32
        acc = acc + b_ref[...]

        # --- BatchNorm1d (training mode): one-pass biased batch stats per channel ---
        inv_n = 1.0 / float(B * L)
        mean = jnp.sum(acc, axis=0, keepdims=True) * inv_n                          # (1, CT)
        var = jnp.maximum(jnp.sum(acc * acc, axis=0, keepdims=True) * inv_n - mean * mean, 0.0)
        scale = jax.lax.rsqrt(var + eps) * g_ref[...]
        shift = be_ref[...] - mean * scale
        y = acc * scale + shift

        # --- ReLU ---
        y = jnp.maximum(y, 0.0)

        # --- MaxPool1d(pool) along length, floor-truncated ---
        y = y.reshape(B, L, CT)
        if pool > 1:
            y = jnp.max(y[:, :Lp * pool, :].reshape(B, Lp, pool, CT), axis=2)
        o_ref[...] = y

    return kernel


def _block_call(x_blc, w2d, bias_p, gamma_p, beta_p, K, pool, eps=1e-5, cout_tile=LANE):
    """One fused block on a lane-padded (B, L, Cin_p) input; returns (B, L//pool, Cp_out)."""
    B, L, Cin_p = x_blc.shape
    KC, Cp_out = w2d.shape
    assert K % 2 == 1, "odd kernel sizes assumed (padding = K//2 keeps the length)"
    assert KC == K * Cin_p and Cp_out % cout_tile == 0 and Cin_p % LANE == 0
    Lp = L // pool
    pad = K // 2
    apad = _round_up(pad, 8)
    n_ct = Cp_out // cout_tile

    return pl.pallas_call(
        make_block_kernel(K, pool, eps),
        out_shape=jax.ShapeDtypeStruct((B, Lp, Cp_out), jnp.float32),
        grid=(n_ct,),
        in_specs=[
            # full input needed by every output-channel tile (constant index map -> loaded once)
            pl.BlockSpec((B, L, Cin_p), lambda j: (0, 0, 0)),
            pl.BlockSpec((KC, cout_tile), lambda j: (0, j)),
            pl.BlockSpec((1, cout_tile), lambda j: (0, j)),
            pl.BlockSpec((1, cout_tile), lambda j: (0, j)),
            pl.BlockSpec((1, cout_tile), lambda j: (0, j)),
        ],
        out_specs=pl.BlockSpec((B, Lp, cout_tile), lambda j: (0, 0, j)),
        scratch_shapes=[pltpu.VMEM((B, L + 2 * apad, Cin_p), jnp.float32)],
        compiler_params=pltpu.CompilerParams(
            # channel tiles are independent -> shardable across v7x's two TensorCores
            dimension_semantics=("parallel",),
            # conservative scoped-VMEM request; fits v7x (64 MiB phys) as well as v5e/v6e
            vmem_limit_bytes=32 * 1024 * 1024,
        ),
    )(x_blc, w2d, bias_p, gamma_p, beta_p)


def _prep_layer_params(w_oik, b, gamma, beta, cin_p, cout_tile=LANE):
    """PyTorch-layout (Cout, Cin, K) params -> lane-dense, im2col-ready kernel operands."""
    Cout, Cin, K = w_oik.shape
    Cp_out = _round_up(Cout, cout_tile)
    w = jnp.transpose(w_oik, (2, 1, 0))                                  # (K, Cin, Cout)
    w = jnp.pad(w, ((0, 0), (0, cin_p - Cin), (0, Cp_out - Cout)))       # zero rows/cols for padding
    w2d = w.reshape(K * cin_p, Cp_out).astype(jnp.float32)

    def vec(v):  # zero-padded affine params -> padded output channels stay exactly 0
        return jnp.pad(v, (0, Cp_out - Cout)).reshape(1, Cp_out).astype(jnp.float32)

    return w2d, vec(b), vec(gamma), vec(beta), Cp_out, K


def init_params(key, in_channels, conv_channels, kernel_sizes):
    """Deterministic parameter init mirroring the PyTorch module's parameter shapes."""
    params = []
    c_in = in_channels
    for c_out, k in zip(conv_channels, kernel_sizes):
        key, kw, kb, kg, kbe = jax.random.split(key, 5)
        bound = 1.0 / math.sqrt(c_in * k)
        w = jax.random.uniform(kw, (c_out, c_in, k), jnp.float32, -bound, bound)  # (Cout, Cin, K)
        b = jax.random.uniform(kb, (c_out,), jnp.float32, -bound, bound)
        gamma = 1.0 + 0.1 * jax.random.normal(kg, (c_out,), jnp.float32)
        beta = 0.1 * jax.random.normal(kbe, (c_out,), jnp.float32)
        params.append((w, b, gamma, beta))
        c_in = c_out
    return params


@partial(jax.jit, static_argnames=("pool_sizes",))
def denoising_encoder_forward(x_ncl, params, pool_sizes):
    """x_ncl: (batch, in_channels, seq_len). Returns (latent, skips) in PyTorch NCL layout."""
    x = jnp.transpose(x_ncl, (0, 2, 1)).astype(jnp.float32)     # NCL -> BLC
    cin = x.shape[-1]
    cin_p = _round_up(cin, LANE)
    x = jnp.pad(x, ((0, 0), (0, 0), (0, cin_p - cin)))          # one-time lane padding of channels
    skips = []
    for (w_oik, b, gamma, beta), pool in zip(params, pool_sizes):
        cout = w_oik.shape[0]
        w2d, bp, gp, bep, cp_out, K = _prep_layer_params(w_oik, b, gamma, beta, cin_p)
        x = _block_call(x, w2d, bp, gp, bep, K, pool)           # (B, L//pool, cp_out); padded ch = 0
        # TODO(synk): could emit the NCL skip as a second kernel output to fold this transpose
        # into the writeback; kept in the wrapper for robustness (pure layout plumbing).
        skips.append(jnp.transpose(x[:, :, :cout], (0, 2, 1)))
        cin_p = cp_out
    return skips[-1], skips                                     # latent IS the last block output


def _reference_forward(x_ncl, params, pool_sizes, eps=1e-5):
    """Pure-JAX reference of the PyTorch forward (training-mode BN), in NCL layout."""
    x = x_ncl
    outs = []
    for (w, b, g, be), pool in zip(params, pool_sizes):
        pad = w.shape[2] // 2
        y = jax.lax.conv_general_dilated(
            x, w, window_strides=(1,), padding=[(pad, pad)],
            dimension_numbers=("NCH", "OIH", "NCH"),
            precision=jax.lax.Precision.HIGHEST)
        y = y + b[None, :, None]
        mean = jnp.mean(y, axis=(0, 2), keepdims=True)
        var = jnp.mean((y - mean) ** 2, axis=(0, 2), keepdims=True)
        y = (y - mean) * jax.lax.rsqrt(var + eps) * g[None, :, None] + be[None, :, None]
        y = jnp.maximum(y, 0.0)
        B, C, L = y.shape
        Lp = L // pool
        y = jnp.max(y[:, :, :Lp * pool].reshape(B, C, Lp, pool), axis=-1)
        outs.append(y)
        x = y
    return x, outs


if __name__ == "__main__":
    # Small shapes consistent with the module's forward: x is (batch, in_channels, seq_len).
    batch, in_channels, seq_len = 2, 4, 16
    conv_channels = (8, 16)
    kernel_sizes = (3, 5)
    pool_sizes = (2, 2)

    key = jax.random.PRNGKey(0)
    key, kx = jax.random.split(key)
    x = jax.random.normal(kx, (batch, in_channels, seq_len), jnp.float32)
    params = init_params(key, in_channels, conv_channels, kernel_sizes)

    latent, skips = denoising_encoder_forward(x, params, pool_sizes=pool_sizes)
    latent = jax.block_until_ready(latent)
    skips = [jax.block_until_ready(s) for s in skips]

    # Shape bookkeeping mirrors the module's _final_conv_channels / _final_seq_len.
    cur_len = seq_len
    for s, c_out, p in zip(skips, conv_channels, pool_sizes):
        cur_len //= p
        assert s.shape == (batch, c_out, cur_len), s.shape
    assert latent.shape == (batch, conv_channels[-1], cur_len), latent.shape
    assert bool(jnp.all(jnp.isfinite(latent)))

    # Numerical check against a pure-JAX/XLA reference of the PyTorch forward.
    ref_latent, ref_skips = _reference_forward(x, params, pool_sizes)
    err = float(jnp.max(jnp.abs(latent - ref_latent)))
    assert jnp.allclose(latent, ref_latent, rtol=3e-2, atol=3e-2), err
    for s, r in zip(skips, ref_skips):
        assert jnp.allclose(s, r, rtol=3e-2, atol=3e-2)

    print("KERNEL_OK")
</pallas_src>

<mosaic_0001>
module attributes {stable_mosaic.version = 11 : i64} {
  func.func @kernel(%arg0: i32, %arg1: memref<2x16x128xf32, #tpu.memory_space<vmem>>, %arg2: memref<384x128xf32, #tpu.memory_space<vmem>>, %arg3: memref<1x128xf32, #tpu.memory_space<vmem>>, %arg4: memref<1x128xf32, #tpu.memory_space<vmem>>, %arg5: memref<1x128xf32, #tpu.memory_space<vmem>>, %arg6: memref<2x8x128xf32, #tpu.memory_space<vmem>>, %arg7: memref<2x32x128xf32, #tpu.memory_space<vmem>>) attributes {dimension_semantics = [#tpu.dimension_semantics<parallel>], iteration_bounds = array<i64: 1>, scalar_prefetch = 0 : i64, scratch_operands = 1 : i64, tpu.core_type = #tpu.core_type<tc>, window_params = [{pipeline_mode = #tpu.pipeline_mode<synchronous>, transform_indices = @transform_0, window_bounds = array<i64: 2, 16, 128>}, {transform_indices = @transform_1, window_bounds = array<i64: 384, 128>}, {transform_indices = @transform_2, window_bounds = array<i64: 1, 128>}, {transform_indices = @transform_3, window_bounds = array<i64: 1, 128>}, {transform_indices = @transform_4, window_bounds = array<i64: 1, 128>}, {transform_indices = @transform_5, window_bounds = array<i64: 2, 8, 128>}]} {
    %cst = arith.constant 0.000000e+00 : f32
    %0 = vector.broadcast %cst : f32 to vector<2x32x128xf32>
    %c0 = arith.constant 0 : index
    %c0_0 = arith.constant 0 : index
    %c0_1 = arith.constant 0 : index
    %1 = vector.load %arg7[%c0, %c0_0, %c0_1] : memref<2x32x128xf32, #tpu.memory_space<vmem>>, vector<2x32x128xf32>
    tpu.vector_store %arg7[%c0, %c0_0, %c0_1], %0 {strides = array<i32>} : memref<2x32x128xf32, #tpu.memory_space<vmem>>, vector<2x32x128xf32>,
    %c0_2 = arith.constant 0 : index
    %c0_3 = arith.constant 0 : index
    %c0_4 = arith.constant 0 : index
    %2 = vector.load %arg1[%c0_2, %c0_3, %c0_4] : memref<2x16x128xf32, #tpu.memory_space<vmem>>, vector<2x16x128xf32>
    %c0_5 = arith.constant 0 : index
    %c8 = arith.constant 8 : index
    %c0_6 = arith.constant 0 : index
    %3 = vector.load %arg7[%c0_5, %c8, %c0_6] : memref<2x32x128xf32, #tpu.memory_space<vmem>>, vector<2x16x128xf32>
    tpu.vector_store %arg7[%c0_5, %c8, %c0_6], %2 {strides = array<i32>} : memref<2x32x128xf32, #tpu.memory_space<vmem>>, vector<2x16x128xf32>,
    %c0_7 = arith.constant 0 : index
    %c0_8 = arith.constant 0 : index
    %c0_9 = arith.constant 0 : index
    %4 = vector.load %arg7[%c0_7, %c0_8, %c0_9] : memref<2x32x128xf32, #tpu.memory_space<vmem>>, vector<2x32x128xf32>
    %5 = vector.extract_strided_slice %4 {offsets = [0, 7, 0], sizes = [2, 16, 128], strides = [1, 1, 1]} : vector<2x32x128xf32> to vector<2x16x128xf32>
    %6 = vector.extract_strided_slice %4 {offsets = [0, 8, 0], sizes = [2, 16, 128], strides = [1, 1, 1]} : vector<2x32x128xf32> to vector<2x16x128xf32>
    %7 = vector.extract_strided_slice %4 {offsets = [0, 9, 0], sizes = [2, 16, 128], strides = [1, 1, 1]} : vector<2x32x128xf32> to vector<2x16x128xf32>
    %8 = tpu.concatenate %5, %6, %7 in 2 : vector<2x16x128xf32>, vector<2x16x128xf32>, vector<2x16x128xf32> -> vector<2x16x384xf32>
    %9 = vector.shape_cast %8 : vector<2x16x384xf32> to vector<32x384xf32>
    %c0_10 = arith.constant 0 : index
    %c0_11 = arith.constant 0 : index
    %10 = vector.load %arg2[%c0_10, %c0_11] : memref<384x128xf32, #tpu.memory_space<vmem>>, vector<384x128xf32>
    %cst_12 = arith.constant dense<0.000000e+00> : vector<32x128xf32>
    %11 = tpu.matmul %9, %10, %cst_12 {dimension_numbers = #tpu.dot_dimension_numbers<[1], [0], [0], [1], [0, 0, 1, 1], [], []>} : vector<32x384xf32>, vector<384x128xf32>, vector<32x128xf32> -> vector<32x128xf32>
    %c0_13 = arith.constant 0 : index
    %c0_14 = arith.constant 0 : index
    %12 = vector.load %arg3[%c0_13, %c0_14] : memref<1x128xf32, #tpu.memory_space<vmem>>, vector<1x128xf32>
    %13 = vector.broadcast %12 : vector<1x128xf32> to vector<32x128xf32>
    %14 = arith.addf %11, %13 : vector<32x128xf32>
    %cst_15 = arith.constant dense<0.000000e+00> : vector<128xf32>
    %15 = vector.multi_reduction <add>, %14, %cst_15 [0] : vector<32x128xf32> to vector<128xf32>
    %16 = vector.shape_cast %15 : vector<128xf32> to vector<1x128xf32>
    %cst_16 = arith.constant 3.125000e-02 : f32
    %17 = vector.broadcast %cst_16 : f32 to vector<1x128xf32>
    %18 = arith.mulf %16, %17 : vector<1x128xf32>
    %19 = arith.mulf %14, %14 : vector<32x128xf32>
    %cst_17 = arith.constant dense<0.000000e+00> : vector<128xf32>
    %20 = vector.multi_reduction <add>, %19, %cst_17 [0] : vector<32x128xf32> to vector<128xf32>
    %21 = vector.shape_cast %20 : vector<128xf32> to vector<1x128xf32>
    %cst_18 = arith.constant 3.125000e-02 : f32
    %22 = vector.broadcast %cst_18 : f32 to vector<1x128xf32>
    %23 = arith.mulf %21, %22 : vector<1x128xf32>
    %24 = arith.mulf %18, %18 : vector<1x128xf32>
    %25 = arith.subf %23, %24 : vector<1x128xf32>
    %cst_19 = arith.constant 0.000000e+00 : f32
    %26 = vector.broadcast %cst_19 : f32 to vector<1x128xf32>
    %27 = arith.maximumf %25, %26 : vector<1x128xf32>
    %cst_20 = arith.constant 9.99999974E-6 : f32
    %28 = vector.broadcast %cst_20 : f32 to vector<1x128xf32>
    %29 = arith.addf %27, %28 : vector<1x128xf32>
    %30 = math.rsqrt %29 : vector<1x128xf32>
    %c0_21 = arith.constant 0 : index
    %c0_22 = arith.constant 0 : index
    %31 = vector.load %arg4[%c0_21, %c0_22] : memref<1x128xf32, #tpu.memory_space<vmem>>, vector<1x128xf32>
    %32 = arith.mulf %30, %31 : vector<1x128xf32>
    %c0_23 = arith.constant 0 : index
    %c0_24 = arith.constant 0 : index
    %33 = vector.load %arg5[%c0_23, %c0_24] : memref<1x128xf32, #tpu.memory_space<vmem>>, vector<1x128xf32>
    %34 = arith.mulf %18, %32 : vector<1x128xf32>
    %35 = arith.subf %33, %34 : vector<1x128xf32>
    %36 = vector.broadcast %32 : vector<1x128xf32> to vector<32x128xf32>
    %37 = arith.mulf %14, %36 : vector<32x128xf32>
    %38 = vector.broadcast %35 : vector<1x128xf32> to vector<32x128xf32>
    %39 = arith.addf %37, %38 : vector<32x128xf32>
    %cst_25 = arith.constant 0.000000e+00 : f32
    %40 = vector.broadcast %cst_25 : f32 to vector<32x128xf32>
    %41 = arith.maximumf %39, %40 : vector<32x128xf32>
    %42 = vector.shape_cast %41 : vector<32x128xf32> to vector<2x16x128xf32>
    %43 = vector.shape_cast %42 : vector<2x16x128xf32> to vector<2x8x2x128xf32>
    %cst_26 = arith.constant dense<0xFF800000> : vector<2x8x128xf32>
    %44 = vector.multi_reduction <maximumf>, %43, %cst_26 [2] : vector<2x8x2x128xf32> to vector<2x8x128xf32>
    %c0_27 = arith.constant 0 : index
    %c0_28 = arith.constant 0 : index
    %c0_29 = arith.constant 0 : index
    %45 = vector.load %arg6[%c0_27, %c0_28, %c0_29] : memref<2x8x128xf32, #tpu.memory_space<vmem>>, vector<2x8x128xf32>
    tpu.vector_store %arg6[%c0_27, %c0_28, %c0_29], %44 {strides = array<i32>} : memref<2x8x128xf32, #tpu.memory_space<vmem>>, vector<2x8x128xf32>,
    return
  }
  func.func @transform_0(%arg0: i32) -> (i32, i32, i32) {
    %c0_i32 = arith.constant 0 : i32
    %c0_i32_0 = arith.constant 0 : i32
    %c0_i32_1 = arith.constant 0 : i32
    %c0_i32_2 = arith.constant 0 : i32
    return %c0_i32, %c0_i32_0, %c0_i32_1 : i32, i32, i32
  }
  func.func @transform_1(%arg0: i32) -> (i32, i32) {
    %c0_i32 = arith.constant 0 : i32
    %c0_i32_0 = arith.constant 0 : i32
    return %c0_i32, %arg0 : i32, i32
  }
  func.func @transform_2(%arg0: i32) -> (i32, i32) {
    %c0_i32 = arith.constant 0 : i32
    %c0_i32_0 = arith.constant 0 : i32
    return %c0_i32, %arg0 : i32, i32
  }
  func.func @transform_3(%arg0: i32) -> (i32, i32) {
    %c0_i32 = arith.constant 0 : i32
    %c0_i32_0 = arith.constant 0 : i32
    return %c0_i32, %arg0 : i32, i32
  }
  func.func @transform_4(%arg0: i32) -> (i32, i32) {
    %c0_i32 = arith.constant 0 : i32
    %c0_i32_0 = arith.constant 0 : i32
    return %c0_i32, %arg0 : i32, i32
  }
  func.func @transform_5(%arg0: i32) -> (i32, i32, i32) {
    %c0_i32 = arith.constant 0 : i32
    %c0_i32_0 = arith.constant 0 : i32
    %c0_i32_1 = arith.constant 0 : i32
    return %c0_i32, %c0_i32_0, %arg0 : i32, i32, i32
  }
}

module attributes {stable_mosaic.version = 11 : i64} {
  func.func @kernel(%arg0: i32, %arg1: memref<2x8x128xf32, #tpu.memory_space<vmem>>, %arg2: memref<640x128xf32, #tpu.memory_space<vmem>>, %arg3: memref<1x128xf32, #tpu.memory_space<vmem>>, %arg4: memref<1x128xf32, #tpu.memory_space<vmem>>, %arg5: memref<1x128xf32, #tpu.memory_space<vmem>>, %arg6: memref<2x4x128xf32, #tpu.memory_space<vmem>>, %arg7: memref<2x24x128xf32, #tpu.memory_space<vmem>>) attributes {dimension_semantics = [#tpu.dimension_semantics<parallel>], iteration_bounds = array<i64: 1>, scalar_prefetch = 0 : i64, scratch_operands = 1 : i64, tpu.core_type = #tpu.core_type<tc>, window_params = [{pipeline_mode = #tpu.pipeline_mode<synchronous>, transform_indices = @transform_0, window_bounds = array<i64: 2, 8, 128>}, {transform_indices = @transform_1, window_bounds = array<i64: 640, 128>}, {transform_indices = @transform_2, window_bounds = array<i64: 1, 128>}, {transform_indices = @transform_3, window_bounds = array<i64: 1, 128>}, {transform_indices = @transform_4, window_bounds = array<i64: 1, 128>}, {transform_indices = @transform_5, window_bounds = array<i64: 2, 4, 128>}]} {
    %cst = arith.constant 0.000000e+00 : f32
    %0 = vector.broadcast %cst : f32 to vector<2x24x128xf32>
    %c0 = arith.constant 0 : index
    %c0_0 = arith.constant 0 : index
    %c0_1 = arith.constant 0 : index
    %1 = vector.load %arg7[%c0, %c0_0, %c0_1] : memref<2x24x128xf32, #tpu.memory_space<vmem>>, vector<2x24x128xf32>
    tpu.vector_store %arg7[%c0, %c0_0, %c0_1], %0 {strides = array<i32>} : memref<2x24x128xf32, #tpu.memory_space<vmem>>, vector<2x24x128xf32>,
    %c0_2 = arith.constant 0 : index
    %c0_3 = arith.constant 0 : index
    %c0_4 = arith.constant 0 : index
    %2 = vector.load %arg1[%c0_2, %c0_3, %c0_4] : memref<2x8x128xf32, #tpu.memory_space<vmem>>, vector<2x8x128xf32>
    %c0_5 = arith.constant 0 : index
    %c8 = arith.constant 8 : index
    %c0_6 = arith.constant 0 : index
    %3 = vector.load %arg7[%c0_5, %c8, %c0_6] : memref<2x24x128xf32, #tpu.memory_space<vmem>>, vector<2x8x128xf32>
    tpu.vector_store %arg7[%c0_5, %c8, %c0_6], %2 {strides = array<i32>} : memref<2x24x128xf32, #tpu.memory_space<vmem>>, vector<2x8x128xf32>,
    %c0_7 = arith.constant 0 : index
    %c0_8 = arith.constant 0 : index
    %c0_9 = arith.constant 0 : index
    %4 = vector.load %arg7[%c0_7, %c0_8, %c0_9] : memref<2x24x128xf32, #tpu.memory_space<vmem>>, vector<2x24x128xf32>
    %5 = vector.extract_strided_slice %4 {offsets = [0, 6, 0], sizes = [2, 8, 128], strides = [1, 1, 1]} : vector<2x24x128xf32> to vector<2x8x128xf32>
    %6 = vector.extract_strided_slice %4 {offsets = [0, 7, 0], sizes = [2, 8, 128], strides = [1, 1, 1]} : vector<2x24x128xf32> to vector<2x8x128xf32>
    %7 = vector.extract_strided_slice %4 {offsets = [0, 8, 0], sizes = [2, 8, 128], strides = [1, 1, 1]} : vector<2x24x128xf32> to vector<2x8x128xf32>
    %8 = vector.extract_strided_slice %4 {offsets = [0, 9, 0], sizes = [2, 8, 128], strides = [1, 1, 1]} : vector<2x24x128xf32> to vector<2x8x128xf32>
    %9 = vector.extract_strided_slice %4 {offsets = [0, 10, 0], sizes = [2, 8, 128], strides = [1, 1, 1]} : vector<2x24x128xf32> to vector<2x8x128xf32>
    %10 = tpu.concatenate %5, %6, %7, %8, %9 in 2 : vector<2x8x128xf32>, vector<2x8x128xf32>, vector<2x8x128xf32>, vector<2x8x128xf32>, vector<2x8x128xf32> -> vector<2x8x640xf32>
    %11 = vector.shape_cast %10 : vector<2x8x640xf32> to vector<16x640xf32>
    %c0_10 = arith.constant 0 : index
    %c0_11 = arith.constant 0 : index
    %12 = vector.load %arg2[%c0_10, %c0_11] : memref<640x128xf32, #tpu.memory_space<vmem>>, vector<640x128xf32>
    %cst_12 = arith.constant dense<0.000000e+00> : vector<16x128xf32>
    %13 = tpu.matmul %11, %12, %cst_12 {dimension_numbers = #tpu.dot_dimension_numbers<[1], [0], [0], [1], [0, 0, 1, 1], [], []>} : vector<16x640xf32>, vector<640x128xf32>, vector<16x128xf32> -> vector<16x128xf32>
    %c0_13 = arith.constant 0 : index
    %c0_14 = arith.constant 0 : index
    %14 = vector.load %arg3[%c0_13, %c0_14] : memref<1x128xf32, #tpu.memory_space<vmem>>, vector<1x128xf32>
    %15 = vector.broadcast %14 : vector<1x128xf32> to vector<16x128xf32>
    %16 = arith.addf %13, %15 : vector<16x128xf32>
    %cst_15 = arith.constant dense<0.000000e+00> : vector<128xf32>
    %17 = vector.multi_reduction <add>, %16, %cst_15 [0] : vector<16x128xf32> to vector<128xf32>
    %18 = vector.shape_cast %17 : vector<128xf32> to vector<1x128xf32>
    %cst_16 = arith.constant 6.250000e-02 : f32
    %19 = vector.broadcast %cst_16 : f32 to vector<1x128xf32>
    %20 = arith.mulf %18, %19 : vector<1x128xf32>
    %21 = arith.mulf %16, %16 : vector<16x128xf32>
    %cst_17 = arith.constant dense<0.000000e+00> : vector<128xf32>
    %22 = vector.multi_reduction <add>, %21, %cst_17 [0] : vector<16x128xf32> to vector<128xf32>
    %23 = vector.shape_cast %22 : vector<128xf32> to vector<1x128xf32>
    %cst_18 = arith.constant 6.250000e-02 : f32
    %24 = vector.broadcast %cst_18 : f32 to vector<1x128xf32>
    %25 = arith.mulf %23, %24 : vector<1x128xf32>
    %26 = arith.mulf %20, %20 : vector<1x128xf32>
    %27 = arith.subf %25, %26 : vector<1x128xf32>
    %cst_19 = arith.constant 0.000000e+00 : f32
    %28 = vector.broadcast %cst_19 : f32 to vector<1x128xf32>
    %29 = arith.maximumf %27, %28 : vector<1x128xf32>
    %cst_20 = arith.constant 9.99999974E-6 : f32
    %30 = vector.broadcast %cst_20 : f32 to vector<1x128xf32>
    %31 = arith.addf %29, %30 : vector<1x128xf32>
    %32 = math.rsqrt %31 : vector<1x128xf32>
    %c0_21 = arith.constant 0 : index
    %c0_22 = arith.constant 0 : index
    %33 = vector.load %arg4[%c0_21, %c0_22] : memref<1x128xf32, #tpu.memory_space<vmem>>, vector<1x128xf32>
    %34 = arith.mulf %32, %33 : vector<1x128xf32>
    %c0_23 = arith.constant 0 : index
    %c0_24 = arith.constant 0 : index
    %35 = vector.load %arg5[%c0_23, %c0_24] : memref<1x128xf32, #tpu.memory_space<vmem>>, vector<1x128xf32>
    %36 = arith.mulf %20, %34 : vector<1x128xf32>
    %37 = arith.subf %35, %36 : vector<1x128xf32>
    %38 = vector.broadcast %34 : vector<1x128xf32> to vector<16x128xf32>
    %39 = arith.mulf %16, %38 : vector<16x128xf32>
    %40 = vector.broadcast %37 : vector<1x128xf32> to vector<16x128xf32>
    %41 = arith.addf %39, %40 : vector<16x128xf32>
    %cst_25 = arith.constant 0.000000e+00 : f32
    %42 = vector.broadcast %cst_25 : f32 to vector<16x128xf32>
    %43 = arith.maximumf %41, %42 : vector<16x128xf32>
    %44 = vector.shape_cast %43 : vector<16x128xf32> to vector<2x8x128xf32>
    %45 = vector.shape_cast %44 : vector<2x8x128xf32> to vector<2x4x2x128xf32>
    %cst_26 = arith.constant dense<0xFF800000> : vector<2x4x128xf32>
    %46 = vector.multi_reduction <maximumf>, %45, %cst_26 [2] : vector<2x4x2x128xf32> to vector<2x4x128xf32>
    %c0_27 = arith.constant 0 : index
    %c0_28 = arith.constant 0 : index
    %c0_29 = arith.constant 0 : index
    %47 = vector.load %arg6[%c0_27, %c0_28, %c0_29] : memref<2x4x128xf32, #tpu.memory_space<vmem>>, vector<2x4x128xf32>
    tpu.vector_store %arg6[%c0_27, %c0_28, %c0_29], %46 {strides = array<i32>} : memref<2x4x128xf32, #tpu.memory_space<vmem>>, vector<2x4x128xf32>,
    return
  }
  func.func @transform_0(%arg0: i32) -> (i32, i32, i32) {
    %c0_i32 = arith.constant 0 : i32
    %c0_i32_0 = arith.constant 0 : i32
    %c0_i32_1 = arith.constant 0 : i32
    %c0_i32_2 = arith.constant 0 : i32
    return %c0_i32, %c0_i32_0, %c0_i32_1 : i32, i32, i32
  }
  func.func @transform_1(%arg0: i32) -> (i32, i32) {
    %c0_i32 = arith.constant 0 : i32
    %c0_i32_0 = arith.constant 0 : i32
    return %c0_i32, %arg0 : i32, i32
  }
  func.func @transform_2(%arg0: i32) -> (i32, i32) {
    %c0_i32 = arith.constant 0 : i32
    %c0_i32_0 = arith.constant 0 : i32
    return %c0_i32, %arg0 : i32, i32
  }
  func.func @transform_3(%arg0: i32) -> (i32, i32) {
    %c0_i32 = arith.constant 0 : i32
    %c0_i32_0 = arith.constant 0 : i32
    return %c0_i32, %arg0 : i32, i32
  }
  func.func @transform_4(%arg0: i32) -> (i32, i32) {
    %c0_i32 = arith.constant 0 : i32
    %c0_i32_0 = arith.constant 0 : i32
    return %c0_i32, %arg0 : i32, i32
  }
  func.func @transform_5(%arg0: i32) -> (i32, i32, i32) {
    %c0_i32 = arith.constant 0 : i32
    %c0_i32_0 = arith.constant 0 : i32
    %c0_i32_1 = arith.constant 0 : i32
    return %c0_i32, %c0_i32_0, %arg0 : i32, i32, i32
  }
}

</mosaic_0001>

<bundles_post_ra>
// kernel: denoising_encoder_forward.3
= control target key start
LH: loop header
LB: loop body
LE: loop exit
PB: predicated region body
PF: predicated region fallthrough
CT: control target
= control target key end

     0   :  { %vm40_vm0 = vcmask 1046528   ;;  %vm51_vm1 = vcmask 1044480   ;;  %vm65_vm2 = vcmask 1041408   ;;  %vm58_vm3 = vcmask 1043456   ;;  %s1156_s1 = inlined_call_operand.vmem [shape: f32[640,128], index: 1, kind: input, shape index: {}]   ;;  %s1157_s0 = inlined_call_operand.vmem [shape: f32[2,8,128], index: 0, kind: input, shape index: {}]   ;;  %s1158_s2 = inlined_call_operand.vmem [shape: f32[1,128], index: 2, kind: input, shape index: {}]   ;;  %s1159_s3 = inlined_call_operand.vmem [shape: f32[1,128], index: 3, kind: input, shape index: {}]   ;;  %s1160_s4 = inlined_call_operand.vmem [shape: f32[1,128], index: 4, kind: input, shape index: {}]   ;;  %s1161_s5 = inlined_call_operand.vmem [shape: f32[2,4,128], index: 5, kind: output, shape index: {}]  }
   0x1   :  { %v120_v0 = vld [vmem:[%s1156_s1 + $0x80] sm:$0xff]  ;;  %v121_v1 = vld [vmem:[%s1156_s1 + $0x88] sm:$0xff]  ;;  %v122_v11 = vld [vmem:[%s1156_s1 + $0x90] sm:$0xff]  ;;  %vm568_vm4 = vcmask 1041409   ;;  %vm570_vm5 = vcmask 1042434   ;;  %vm572_vm6 = vcmask 1043459  }
   0x2   :  { %v104_v2 = vld [vmem:[%s1156_s1] sm:$0xff]  ;;  %v717_v3 = vpack.c.bf16 %v121_v1, %v120_v0  ;;  %v105_v4 = vld [vmem:[%s1156_s1 + $0x8] sm:$0xff]  ;;  %v123_v13 = vld [vmem:[%s1156_s1 + $0x98] sm:$0xff] }
   0x3   :  { %v152_v5 = vld [vmem:[%s1156_s1 + $0x180] sm:$0xff]  ;;  %v153_v6 = vld [vmem:[%s1156_s1 + $0x188] sm:$0xff]  ;;  %v719_v7 = vpack.c.bf16 %v105_v4, %v104_v2  ;;  %v106_v14 = vld [vmem:[%s1156_s1 + $0x10] sm:$0xff]  ;;  %v721_v16 = vpack.c.bf16 %v123_v13, %v122_v11 }
   0x4   :  { %v749_v8 = vpack.c.bf16 %v153_v6, %v152_v5  ;;  %v136_v9 = vld [vmem:[%s1156_s1 + $0x100] sm:$0xff]  ;;  %v137_v10 = vld [vmem:[%s1156_s1 + $0x108] sm:$0xff]  ;;  %718 = vmatprep.subr.bf16.mxu0 %v717_v3  ;;  %v107_v15 = vld [vmem:[%s1156_s1 + $0x18] sm:$0xff] }
   0x5   :  { %v751_v12 = vpack.c.bf16 %v137_v10, %v136_v9  ;;  %720 = vmatpush3.bf16.msra.mxu0 %v719_v7  ;;  %v723_v17 = vpack.c.bf16 %v107_v15, %v106_v14  ;;  %v154_v18 = vld [vmem:[%s1156_s1 + $0x190] sm:$0xff]  ;;  %v155_v19 = vld [vmem:[%s1156_s1 + $0x198] sm:$0xff]  ;;  %v124_v23 = vld [vmem:[%s1156_s1 + $0xa0] sm:$0xff]  ;;  %v817_v10 = vmov 0.0  }
   0x6   :  { %750 = vmatprep.subr.bf16.mxu1 %v749_v8  ;;  %v138_v20 = vld [vmem:[%s1156_s1 + $0x110] sm:$0xff]  ;;  %v753_v21 = vpack.c.bf16 %v155_v19, %v154_v18  ;;  %v139_v22 = vld [vmem:[%s1156_s1 + $0x118] sm:$0xff]  ;;  %v125_v24 = vld [vmem:[%s1156_s1 + $0xa8] sm:$0xff]  ;;  %722 = vmatprep.subr.bf16.mxu0 %v721_v16  ;;  %v41_v11 = vrot.slane %v817_v10, 1  ;;  %v53_v14 = vrot.slane %v817_v10, 3 }
   0x7   :  { %752 = vmatpush3.bf16.msra.mxu1 %v751_v12  ;;  %v755_v25 = vpack.c.bf16 %v139_v22, %v138_v20  ;;  %v725_v26 = vpack.c.bf16 %v125_v24, %v124_v23  ;;  %v108_v27 = vld [vmem:[%s1156_s1 + $0x20] sm:$0xff]  ;;  %v109_v28 = vld [vmem:[%s1156_s1 + $0x28] sm:$0xff]  ;;  %v126_v35 = vld [vmem:[%s1156_s1 + $0xb0] sm:$0xff] }
   0x8   :  { %v156_v29 = vld [vmem:[%s1156_s1 + $0x1a0] sm:$0xff]  ;;  %754 = vmatprep.subr.bf16.mxu1 %v753_v21  ;;  %v157_v30 = vld [vmem:[%s1156_s1 + $0x1a8] sm:$0xff]  ;;  %v727_v33 = vpack.c.bf16 %v109_v28, %v108_v27  ;;  %v127_v36 = vld [vmem:[%s1156_s1 + $0xb8] sm:$0xff] }
   0x9   :  { %v140_v31 = vld [vmem:[%s1156_s1 + $0x120] sm:$0xff]  ;;  %v141_v32 = vld [vmem:[%s1156_s1 + $0x128] sm:$0xff]  ;;  %724 = vmatpush3.bf16.msra.mxu0 %v723_v17  ;;  %v757_v34 = vpack.c.bf16 %v157_v30, %v156_v29  ;;  %v110_v37 = vld [vmem:[%s1156_s1 + $0x30] sm:$0xff]  ;;  %v729_v39 = vpack.c.bf16 %v127_v36, %v126_v35 }
   0xa   :  { %726 = vmatprep.subr.bf16.mxu0 %v725_v26  ;;  %v759_v38 = vpack.c.bf16 %v141_v32, %v140_v31  ;;  %v111_v40 = vld [vmem:[%s1156_s1 + $0x38] sm:$0xff]  ;;  %v158_v41 = vld [vmem:[%s1156_s1 + $0x1b0] sm:$0xff]  ;;  %v128_v46 = vld [vmem:[%s1156_s1 + $0xc0] sm:$0xff] }
   0xb   :  { %756 = vmatpush3.bf16.msra.mxu1 %v755_v25  ;;  %v159_v42 = vld [vmem:[%s1156_s1 + $0x1b8] sm:$0xff]  ;;  %v142_v44 = vld [vmem:[%s1156_s1 + $0x130] sm:$0xff]  ;;  %v129_v47 = vld [vmem:[%s1156_s1 + $0xc8] sm:$0xff]  ;;  %v731_v48 = vpack.c.bf16 %v111_v40, %v110_v37 }
   0xc   :  { %758 = vmatprep.subr.bf16.mxu1 %v757_v34  ;;  %v761_v43 = vpack.c.bf16 %v159_v42, %v158_v41  ;;  %v143_v45 = vld [vmem:[%s1156_s1 + $0x138] sm:$0xff]  ;;  %v160_v49 = vld [vmem:[%s1156_s1 + $0x1c0] sm:$0xff]  ;;  %v161_v50 = vld [vmem:[%s1156_s1 + $0x1c8] sm:$0xff]  ;;  %v733_v52 = vpack.c.bf16 %v129_v47, %v128_v46 }
   0xd   :  { %728 = vmatpush3.bf16.msra.mxu0 %v727_v33  ;;  %v763_v51 = vpack.c.bf16 %v143_v45, %v142_v44  ;;  %v112_v53 = vld [vmem:[%s1156_s1 + $0x40] sm:$0xff]  ;;  %v113_v54 = vld [vmem:[%s1156_s1 + $0x48] sm:$0xff]  ;;  %v765_v56 = vpack.c.bf16 %v161_v50, %v160_v49  ;;  %v130_v58 = vld [vmem:[%s1156_s1 + $0xd0] sm:$0xff]  ;;  %v66_v44 = vrot.slane %v817_v10, 6 }
   0xe   :  { %730 = vmatprep.subr.bf16.mxu0 %v729_v39  ;;  %v144_v55 = vld [vmem:[%s1156_s1 + $0x140] sm:$0xff]  ;;  %v145_v57 = vld [vmem:[%s1156_s1 + $0x148] sm:$0xff]  ;;  %v131_v59 = vld [vmem:[%s1156_s1 + $0xd8] sm:$0xff]  ;;  %v735_v62 = vpack.c.bf16 %v113_v54, %v112_v53 }
   0xf   :  { %760 = vmatpush3.bf16.msra.mxu1 %v759_v38  ;;  %v162_v60 = vld [vmem:[%s1156_s1 + $0x1d0] sm:$0xff]  ;;  %v163_v61 = vld [vmem:[%s1156_s1 + $0x1d8] sm:$0xff]  ;;  %v767_v63 = vpack.c.bf16 %v145_v57, %v144_v55  ;;  %v737_v0 = vpack.c.bf16 %v131_v59, %v130_v58  ;;  %v132_v6 = vld [vmem:[%s1156_s1 + $0xe0] sm:$0xff] }
  0x10   :  { %762 = vmatprep.subr.bf16.mxu1 %v761_v43  ;;  %v114_v1 = vld [vmem:[%s1156_s1 + $0x50] sm:$0xff]  ;;  %v115_v2 = vld [vmem:[%s1156_s1 + $0x58] sm:$0xff]  ;;  %v769_v4 = vpack.c.bf16 %v163_v61, %v162_v60  ;;  %v133_v7 = vld [vmem:[%s1156_s1 + $0xe8] sm:$0xff] }
  0x11   :  { %732 = vmatpush3.bf16.msra.mxu0 %v731_v48  ;;  %v146_v3 = vld [vmem:[%s1156_s1 + $0x150] sm:$0xff]  ;;  %v147_v5 = vld [vmem:[%s1156_s1 + $0x158] sm:$0xff]  ;;  %v164_v8 = vld [vmem:[%s1156_s1 + $0x1e0] sm:$0xff]  ;;  %v739_v12 = vpack.c.bf16 %v115_v2, %v114_v1  ;;  %v741_v16 = vpack.c.bf16 %v133_v7, %v132_v6 }
  0x12   :  { %734 = vmatprep.subr.bf16.mxu0 %v733_v52  ;;  %v165_v9 = vld [vmem:[%s1156_s1 + $0x1e8] sm:$0xff]  ;;  %v1008_v13 = vld [vmem:[%s1157_s0] sm:$0xff]  ;;  %v771_v15 = vpack.c.bf16 %v147_v5, %v146_v3  ;;  %v134_v24 = vld [vmem:[%s1156_s1 + $0xf0] sm:$0xff] }
  0x13   :  { %764 = vmatpush3.bf16.msra.mxu1 %v763_v51  ;;  %v116_v17 = vld [vmem:[%s1156_s1 + $0x60] sm:$0xff]  ;;  %v117_v18 = vld [vmem:[%s1156_s1 + $0x68] sm:$0xff]  ;;  %v42_v20 = vrot.slane %v1008_v13, 1  ;;  %v52_v21 = vrot.slane %v1008_v13, 3  ;;  %v773_v22 = vpack.c.bf16 %v165_v9, %v164_v8  ;;  %v135_v25 = vld [vmem:[%s1156_s1 + $0xf8] sm:$0xff]  ;;  %v59_v50 = vrot.slane %v1008_v13, 4 }
  0x14   :  { %766 = vmatprep.subr.bf16.mxu1 %v765_v56  ;;  %v148_v19 = vld [vmem:[%s1156_s1 + $0x160] sm:$0xff]  ;;  %v149_v23 = vld [vmem:[%s1156_s1 + $0x168] sm:$0xff]  ;;  %v166_v26 = vld [vmem:[%s1156_s1 + $0x1f0] sm:$0xff]  ;;  %v743_v30 = vpack.c.bf16 %v117_v18, %v116_v17  ;;  %v745_v36 = vpack.c.bf16 %v135_v25, %v134_v24  ;;  %v1066_v51 = vrot.slane %v817_v10, 4  ;;  %v67_v53 = vrot.slane %v1008_v13, 6 }
  0x15   :  { %736 = vmatpush3.bf16.msra.mxu0 %v735_v62  ;;  %v167_v27 = vld [vmem:[%s1156_s1 + $0x1f8] sm:$0xff]  ;;  %v43_v28 = vsel %vm40_vm0, %v41_v11, %v42_v20  ;;  %v70_v29 = vrot.slane %v42_v20, 6  ;;  %v118_v31 = vld [vmem:[%s1156_s1 + $0x70] sm:$0xff]  ;;  %v54_v33 = vsel %vm51_vm1, %v52_v21, %v53_v14  ;;  %v74_v34 = vrot.slane %v52_v21, 6  ;;  %v1050_v40 = vld [vmem:[%s1157_s0 + $0x8] sm:$0xff] }
  0x16   :  { %738 = vmatprep.subr.bf16.mxu0 %v737_v0  ;;  %v69_v32 = vrot.slane %v43_v28, 6  ;;  %v775_v35 = vpack.c.bf16 %v149_v23, %v148_v19  ;;  %v119_v37 = vld [vmem:[%s1156_s1 + $0x78] sm:$0xff]  ;;  %v150_v38 = vld [vmem:[%s1156_s1 + $0x170] sm:$0xff]  ;;  %v75_v39 = vrot.slane %v54_v33, 6  ;;  %v777_v41 = vpack.c.bf16 %v167_v27, %v166_v26  ;;  %v168_v45 = vld [vmem:[%s1156_s1 + $0x200] sm:$0xff] }
  0x17   :  { %768 = vmatpush3.bf16.msra.mxu1 %v767_v63  ;;  %v151_v43 = vld [vmem:[%s1156_s1 + $0x178] sm:$0xff]  ;;  %v169_v46 = vld [vmem:[%s1156_s1 + $0x208] sm:$0xff]  ;;  %v45_v47 = vrot.slane %v1050_v40, 1  ;;  %v55_v49 = vrot.slane %v1050_v40, 3  ;;  %v747_v52 = vpack.c.bf16 %v119_v37, %v118_v31  ;;  %v170_v58 = vld [vmem:[%s1156_s1 + $0x210] sm:$0xff]  ;;  %v61_v0 = vsel %vm58_vm3, %v59_v50, %v1066_v51 }
  0x18   :  { %770 = vmatprep.subr.bf16.mxu1 %v769_v4  ;;  %v71_v42 = vsel %vm65_vm2, %v69_v32, %v70_v29  ;;  %v76_v48 = vsel %vm65_vm2, %v74_v34, %v75_v39  ;;  %v779_v55 = vpack.c.bf16 %v151_v43, %v150_v38  ;;  %v781_v56 = vpack.c.bf16 %v169_v46, %v168_v45  ;;  %v171_v59 = vld [vmem:[%s1156_s1 + $0x218] sm:$0xff]  ;;  %v172_v4 = vld [vmem:[%s1156_s1 + $0x220] sm:$0xff]  ;;  %v173_v5 = vld [vmem:[%s1156_s1 + $0x228] sm:$0xff] }
  0x19   :  { %740 = vmatpush3.bf16.msra.mxu0 %v739_v12  ;;  %255 = vmatprep.mubr.f32.mxu0 %v71_v42  ;;  %v46_v54 = vsel %vm40_vm0, %v41_v11, %v45_v47  ;;  %v57_v57 = vsel %vm51_vm1, %v55_v49, %v53_v14  ;;  %v84_v61 = vrot.slane %v45_v47, 6  ;;  %v88_v62 = vrot.slane %v55_v49, 6  ;;  %v174_v12 = vld [vmem:[%s1156_s1 + $0x230] sm:$0xff]  ;;  %v175_v14 = vld [vmem:[%s1156_s1 + $0x238] sm:$0xff]  ;;  %v177_v17 = vld [vmem:[%s1156_s1 + $0x248] sm:$0xff] }
  0x1a   :  { %742 = vmatprep.subr.bf16.mxu0 %v741_v16  ;;  %330 = vmatprep.mubr.f32.mxu1 %v76_v48  ;;  %v83_v60 = vrot.slane %v46_v54, 6  ;;  %v89_v63 = vrot.slane %v57_v57, 6  ;;  %v68_v1 = vsel %vm65_vm2, %v66_v44, %v67_v53  ;;  %v81_v2 = vrot.slane %v1050_v40, 6  ;;  %v176_v16 = vld [vmem:[%s1156_s1 + $0x240] sm:$0xff]  ;;  %v178_v19 = vld [vmem:[%s1156_s1 + $0x250] sm:$0xff]  ;;  %v179_v20 = vld [vmem:[%s1156_s1 + $0x258] sm:$0xff] }
  0x1b   :  { %772 = vmatpush3.bf16.msra.mxu1 %v771_v15  ;;  %v785_v3 = vpack.c.bf16 %v171_v59, %v170_v58  ;;  %v77_v7 = vrot.slane %v59_v50, 6  ;;  %v78_v8 = vrot.slane %v61_v0, 6  ;;  %v789_v11 = vpack.c.bf16 %v173_v5, %v172_v4  ;;  %v181_v23 = vld [vmem:[%s1156_s1 + $0x268] sm:$0xff]  ;;  %v182_v26 = vld [vmem:[%s1156_s1 + $0x270] sm:$0xff]  ;;  %v183_v27 = vld [vmem:[%s1156_s1 + $0x278] sm:$0xff] }
  0x1c   :  { %774 = vmatprep.subr.bf16.mxu1 %v773_v22  ;;  %v85_v6 = vsel %vm65_vm2, %v83_v60, %v84_v61  ;;  %v90_v9 = vsel %vm65_vm2, %v88_v62, %v89_v63  ;;  %v82_v10 = vsel %vm65_vm2, %v66_v44, %v81_v2  ;;  %v797_v18 = vpack.c.bf16 %v177_v17, %v176_v16  ;;  %v180_v22 = vld [vmem:[%s1156_s1 + $0x260] sm:$0xff] }
  0x1d   :  { %744 = vmatpush3.bf16.msra.mxu0 %v743_v30  ;;  %v79_v15 = vsel %vm65_vm2, %v77_v7, %v78_v8  ;;  %v801_v21 = vpack.c.bf16 %v179_v20, %v178_v19  ;;  %v805_v24 = vpack.c.bf16 %v181_v23, %v180_v22  ;;  %v62_v25 = vrot.slane %v1050_v40, 4  ;;  %v587_v34 = vld [vmem:[%s1158_s2] ss:$0 sm:$0xff] }
  0x1e   :  { %746 = vmatprep.subr.bf16.mxu0 %v745_v36  ;;  %v809_v28 = vpack.c.bf16 %v183_v27, %v182_v26  ;;  %v441_v20 = vld [vmem:[%s1160_s4] sm:$0x1] }
  0x1f   :  { %776 = vmatpush3.bf16.msra.mxu1 %v775_v35  ;;  %v64_v29 = vsel %vm58_vm3, %v62_v25, %v1066_v51  ;;  %v91_v30 = vrot.slane %v62_v25, 6 }
  0x20   :  { %778 = vmatprep.subr.bf16.mxu1 %v777_v41  ;;  %v92_v31 = vrot.slane %v64_v29, 6 }
  0x21   :  { %748 = vmatpush3.bf16.msra.mxu0 %v747_v52 }
  0x22   :  { %782 = vmatprep.subr.bf16.mxu0 %v781_v56  ;;  %v93_v32 = vsel %vm65_vm2, %v91_v30, %v92_v31 }
  0x23   :  { %780 = vmatpush3.bf16.msra.mxu1 %v779_v55 }
  0x24   :  { %256 = vmatmul.mubr.f32.vlgmr.msra.gmra.mrb[0].mxu0 %v68_v1 }
  0x25   :  { %784 = vmatpush3.bf16.msra.mxu0 %v781_v56  ;;  %260 = vmatprep.mubr.f32.mxu0 %v85_v6 }
  0x26   :  { %331 = vmatmul.mubr.f32.vlgmr.msra.gmra.mrb[0].mxu1 %v1008_v13  ;;  %786 = vmatprep.subr.bf16.mxu0 %v785_v3  ;;  %v793_v13 = vpack.c.bf16 %v175_v14, %v174_v12  ;;  %v444_v12 = vlaneseq }
  0x27   :  { %335 = vmatprep.mubr.f32.mxu1 %v90_v9 }
  0x28   :  { %261 = vmatmul.mubr.f32.gmra.mrb[2].mxu0 %v82_v10  ;;  %v445_v14 = vshrl.u32 %v444_v12, 7 }
  0x29   :  { %788 = vmatpush3.bf16.msra.mxu0 %v785_v3  ;;  %714 = vmatprep.mubr.f32.mxu0 %v79_v15  ;;  %v439_v15 = vld [vmem:[%s1159_s3] sm:$0x1] }
  0x2a   :  { %336 = vmatmul.mubr.f32.gmra.mrb[2].mxu1 %v1050_v40  ;;  %790 = vmatprep.subr.bf16.mxu0 %v789_v11 }
  0x2d   :  { %792 = vmatpush3.bf16.msra.mxu0 %v789_v11 }
  0x2e   :  { %794 = vmatprep.subr.bf16.mxu0 %v793_v13 }
  0x31   :  { %796 = vmatpush3.bf16.msra.mxu0 %v793_v13  ;;  %v446_v13 = vsub.s32 0, %v445_v14 }
  0x32   :  { %798 = vmatprep.subr.bf16.mxu0 %v797_v18 }
  0x35   :  { %800 = vmatpush3.bf16.msra.mxu0 %v797_v18  ;;  %v818_v18 = vmov 1983009808  }
  0x36   :  { %802 = vmatprep.subr.bf16.mxu0 %v801_v21  ;;  %v464_v19 = vunpack.c.l.s4 %v818_v18 }
  0x38   :  { %v465_v26 = vunpack.c.0.s8 %v464_v19 }
  0x39   :  { %804 = vmatpush3.bf16.msra.mxu0 %v801_v21 }
  0x3a   :  { %806 = vmatprep.subr.bf16.mxu0 %v805_v24  ;;  %v468_v30 = vsub.s32 %v465_v26, %v445_v14 }
  0x3d   :  { %808 = vmatpush3.bf16.msra.mxu0 %v805_v24 }
  0x3e   :  { %810 = vmatprep.subr.bf16.mxu0 %v809_v28 }
  0x41   :  { %812 = vmatpush3.bf16.msra.mxu0 %v809_v28 }
  0x44   :  { %715 = vmatmul.mubr.f32.vlgmr.msra.gmra.mrb[4].mxu0 %v93_v32 }
  0xf7   :  { %v620_v33 = vpop.f32.mrb[0].mxu0 }
  0xf8   :  { %v621_v35 = vpop.f32.mrb[1].mxu0 }
  0xf9   :  { %v658_v36 = vpop.f32.mrb[0].mxu1  ;;  %v622_v37 = vadd.f32 %v621_v35, %v620_v33 }
  0xfa   :  { %v659_v38 = vpop.f32.mrb[1].mxu1 }
  0xfb   :  { %v660_v39 = vadd.f32 %v659_v38, %v658_v36  ;;  %v258_v40 = vadd.f32 %v622_v37, %v587_v34  ;;  %v623_v41 = vpop.f32.mrb[2].mxu0 }
  0xfc   :  { %v624_v42 = vpop.f32.mrb[3].mxu0 }
  0xfd   :  { %v661_v43 = vpop.f32.mrb[2].mxu1  ;;  %v625_v44 = vadd.f32 %v624_v42, %v623_v41  ;;  %v333_v46 = vadd.f32 %v660_v39, %v258_v40 }
  0xfe   :  { %v662_v45 = vpop.f32.mrb[3].mxu1 }
  0xff   :  { %v663_v47 = vadd.f32 %v662_v45, %v661_v43  ;;  %v263_v48 = vadd.f32 %v625_v44, %v587_v34 }
 0x101   :  { %v338_v49 = vadd.f32 %v663_v47, %v263_v48 }
 0x117   :  { %v716_v50 = vpop.f32.mrb[4].mxu0 }
 0x118   :  { %v413_v51 = vadd.f32 %v716_v50, %v338_v49  ;;  %v407_v52 = vpop.f32.mrb[5].mxu0 }
 0x119   :  { %v408_v53 = vadd.f32 %v407_v52, %v333_v46 }
 0x11a   :  { %v425_v54 = vmul.f32 %v413_v51, %v413_v51 }
 0x11b   :  { %v416_v55 = vadd.f32 %v413_v51, %v408_v53  ;;  %v424_v56 = vmul.f32 %v408_v53, %v408_v53 }
 0x11d   :  { %v417_v57 = vrot.slane %v416_v55, 4  ;;  %v426_v58 = vadd.f32 %v425_v54, %v424_v56 }
 0x11f   :  { %v418_v59 = vadd.f32 %v417_v57, %v416_v55  ;;  %v427_v60 = vrot.slane %v426_v58, 4 }
 0x121   :  { %v419_v61 = vrot.slane %v418_v59, 2  ;;  %v428_v62 = vadd.f32 %v427_v60, %v426_v58 }
 0x123   :  { %v420_v63 = vadd.f32 %v419_v61, %v418_v59  ;;  %v429_v0 = vrot.slane %v428_v62, 2 }
 0x125   :  { %v421_v1 = vrot.slane %v420_v63, 1  ;;  %v430_v2 = vadd.f32 %v429_v0, %v428_v62 }
 0x127   :  { %v422_v3 = vadd.f32 %v421_v1, %v420_v63  ;;  %v431_v4 = vrot.slane %v430_v2, 1 }
 0x129   :  { %v423_v5 = vmul.f32 0.0625, %v422_v3  ;;  %v432_v6 = vadd.f32 %v431_v4, %v430_v2 }
 0x12b   :  { %v433_v7 = vmul.f32 0.0625, %v432_v6  ;;  %v434_v8 = vmul.f32 %v423_v5, %v423_v5 }
 0x12d   :  { %v435_v9 = vsub.f32 %v433_v7, %v434_v8 }
 0x12f   :  { %v436_v10 = vmax.f32 %v435_v9, 0.0 }
 0x131   :  { %v437_v11 = vadd.f32 1e-05, %v436_v10 }
 0x133   :  { %815 = vrsqrt.f32 %v437_v11 }
 0x13d   :  { %v816_v16 = vpop.eup %815 }
 0x13e   :  { %v440_v17 = vmul.f32 %v816_v16, %v439_v15 }
 0x140   :  { %v442_v21 = vmul.f32 %v440_v17, %v423_v5  ;;  %v447_v22 = vrot.slane %v440_v17, %v446_v13 }
 0x142   :  { %v443_v23 = vsub.f32 %v441_v20, %v442_v21  ;;  %v448_v24 = vmul.f32 %v447_v22, %v408_v53  ;;  %v449_v25 = vmul.f32 %v447_v22, %v413_v51 }
 0x144   :  { %v454_v27 = vrot.slane %v443_v23, %v446_v13 }
 0x146   :  { %v456_v28 = vadd.f32 %v454_v27, %v448_v24  ;;  %v457_v29 = vadd.f32 %v454_v27, %v449_v25 }
 0x148   :  { %v458_v31 = vmax.f32 %v456_v28, 0.0  ;;  %v459_v32 = vmax.f32 %v457_v29, 0.0 }
 0x14a   :  { %v462_v33 = vcombine.high %v458_v31, %v458_v31  ;;  %v469_v34 = vrot.slane %v458_v31, %v468_v30  ;;  %v479_v35 = vcombine.high %v459_v32, %v459_v32  ;;  %v486_v36 = vrot.slane %v459_v32, %v468_v30 }
 0x14c   :  { %v476_v37 = vrot.slane %v462_v33, %v468_v30  ;;  %v477_v38 = vcombine.high %v469_v34, %v469_v34  ;;  %v493_v39 = vrot.slane %v479_v35, %v468_v30  ;;  %v494_v40 = vcombine.high %v486_v36, %v486_v36 }
 0x14d   :  { %v504_v41 = vsel %vm65_vm2, %v469_v34, -inf  ;;  %v532_v42 = vsel %vm65_vm2, %v486_v36, -inf }
 0x14e   :  { %v478_v43 = vcombine.high %v476_v37, %v476_v37  ;;  %v495_v44 = vcombine.high %v493_v39, %v493_v39  ;;  %v505_v45 = vrot.slane %v504_v41, 4  ;;  %v511_v46 = vsel %vm65_vm2, %v477_v38, -inf }
 0x14f   :  { %v512_v47 = vrot.slane %v511_v46, 4  ;;  %v518_v48 = vsel %vm65_vm2, %v476_v37, -inf  ;;  %v533_v49 = vrot.slane %v532_v42, 4  ;;  %v539_v50 = vsel %vm65_vm2, %v494_v40, -inf }
 0x150   :  { %v506_v51 = vmax.f32 %v504_v41, %v505_v45  ;;  %v519_v52 = vrot.slane %v518_v48, 4  ;;  %v525_v53 = vsel %vm65_vm2, %v478_v43, -inf  ;;  %v540_v54 = vrot.slane %v539_v50, 4 }
 0x151   :  { %v513_v55 = vmax.f32 %v511_v46, %v512_v47  ;;  %v526_v56 = vrot.slane %v525_v53, 4  ;;  %v534_v57 = vmax.f32 %v532_v42, %v533_v49  ;;  %v546_v58 = vsel %vm65_vm2, %v493_v39, -inf }
 0x152   :  { %v507_v59 = vrot.slane %v506_v51, 2  ;;  %v520_v60 = vmax.f32 %v518_v48, %v519_v52  ;;  %v541_v61 = vmax.f32 %v539_v50, %v540_v54  ;;  %v547_v62 = vrot.slane %v546_v58, 4 }
 0x153   :  { %v514_v63 = vrot.slane %v513_v55, 2  ;;  %v527_v0 = vmax.f32 %v525_v53, %v526_v56  ;;  %v535_v1 = vrot.slane %v534_v57, 2  ;;  %v553_v2 = vsel %vm65_vm2, %v495_v44, -inf }
 0x154   :  { %v508_v3 = vmax.f32 %v506_v51, %v507_v59  ;;  %v521_v4 = vrot.slane %v520_v60, 2  ;;  %v542_v5 = vrot.slane %v541_v61, 2  ;;  %v548_v6 = vmax.f32 %v546_v58, %v547_v62 }
 0x155   :  { %v515_v7 = vmax.f32 %v513_v55, %v514_v63  ;;  %v528_v8 = vrot.slane %v527_v0, 2  ;;  %v536_v9 = vmax.f32 %v534_v57, %v535_v1  ;;  %v554_v10 = vrot.slane %v553_v2, 4 }
 0x156   :  { %v509_v11 = vrot.slane %v508_v3, 1  ;;  %v522_v12 = vmax.f32 %v520_v60, %v521_v4  ;;  %v543_v14 = vmax.f32 %v541_v61, %v542_v5  ;;  %v549_v15 = vrot.slane %v548_v6, 2 }
 0x157   :  { %v516_v13 = vrot.slane %v515_v7, 1  ;;  %v529_v16 = vmax.f32 %v527_v0, %v528_v8  ;;  %v537_v17 = vrot.slane %v536_v9, 1  ;;  %v555_v18 = vmax.f32 %v553_v2, %v554_v10 }
 0x158   :  { %v523_v19 = vrot.slane %v522_v12, 1  ;;  %v544_v20 = vrot.slane %v543_v14, 1  ;;  %v550_v21 = vmax.f32 %v548_v6, %v549_v15  ;;  %v510_v22 = vmax.f32 %v508_v3, %v509_v11 }
 0x159   :  { %v517_v23 = vmax.f32 %v515_v7, %v516_v13  ;;  %v530_v24 = vrot.slane %v529_v16, 1  ;;  %v556_v25 = vrot.slane %v555_v18, 2  ;;  %v538_v27 = vmax.f32 %v536_v9, %v537_v17 }
 0x15a   :  { %v524_v26 = vmax.f32 %v522_v12, %v523_v19  ;;  %v545_v28 = vmax.f32 %v543_v14, %v544_v20  ;;  %v551_v29 = vrot.slane %v550_v21, 1 }
 0x15b   :  { %v531_v30 = vmax.f32 %v529_v16, %v530_v24  ;;  %v557_v31 = vmax.f32 %v555_v18, %v556_v25  ;;  %v569_v32 = vsel %vm568_vm4, %v517_v23, %v510_v22 }
 0x15c   :  { %v552_v33 = vmax.f32 %v550_v21, %v551_v29  ;;  %v571_v34 = vsel %vm570_vm5, %v524_v26, %v569_v32  ;;  %v574_v35 = vsel %vm568_vm4, %v545_v28, %v538_v27 }
 0x15d   :  { %v558_v36 = vrot.slane %v557_v31, 1  ;;  %v573_v37 = vsel %vm572_vm6, %v531_v30, %v571_v34 }
 0x15e   :  { %v575_v38 = vsel %vm570_vm5, %v552_v33, %v574_v35  ;;  %579 = vst [vmem:[%s1161_s5] sm:$0xf] %v573_v37 }
 0x15f   :  { %v559_v39 = vmax.f32 %v557_v31, %v558_v36 }
 0x161   :  { %v576_v40 = vsel %vm572_vm6, %v559_v39, %v575_v38 }
 0x162   :  { %580 = vst [vmem:[%s1161_s5 + $0x4] sm:$0xf] %v576_v40 }

// kernel: denoising_encoder_forward.2
= control target key start
LH: loop header
LB: loop body
LE: loop exit
PB: predicated region body
PF: predicated region fallthrough
CT: control target
= control target key end

     0   :  { %vm48_vm0 = vcmask 1046528   ;;  %vm57_vm1 = vcmask 1045504   ;;  %vm70_vm2 = vcmask 1040384   ;;  %vm482_vm3 = vcmask 1041408   ;;  %s1133_s1 = inlined_call_operand.vmem [shape: f32[384,128], index: 1, kind: input, shape index: {}]   ;;  %s1134_s0 = inlined_call_operand.vmem [shape: f32[2,16,128], index: 0, kind: input, shape index: {}]   ;;  %s1135_s2 = inlined_call_operand.vmem [shape: f32[1,128], index: 2, kind: input, shape index: {}]   ;;  %s1136_s3 = inlined_call_operand.vmem [shape: f32[1,128], index: 3, kind: input, shape index: {}]   ;;  %s1137_s4 = inlined_call_operand.vmem [shape: f32[1,128], index: 4, kind: input, shape index: {}]   ;;  %s1138_s5 = inlined_call_operand.vmem [shape: f32[2,8,128], index: 5, kind: output, shape index: {}]  }
   0x1   :  { %v129_v0 = vld [vmem:[%s1133_s1 + $0x80] sm:$0xff]  ;;  %v130_v1 = vld [vmem:[%s1133_s1 + $0x88] sm:$0xff]  ;;  %v131_v5 = vld [vmem:[%s1133_s1 + $0x90] sm:$0xff]  ;;  %vm611_vm4 = vcmask 1041409   ;;  %vm613_vm5 = vcmask 1042434   ;;  %vm615_vm6 = vcmask 1043459  }
   0x2   :  { %v113_v2 = vld [vmem:[%s1133_s1] sm:$0xff]  ;;  %v743_v3 = vpack.c.bf16 %v130_v1, %v129_v0  ;;  %v114_v4 = vld [vmem:[%s1133_s1 + $0x8] sm:$0xff]  ;;  %v132_v6 = vld [vmem:[%s1133_s1 + $0x98] sm:$0xff]  ;;  %vm617_vm7 = vcmask 1044484   ;;  %vm619_vm8 = vcmask 1045509   ;;  %vm621_vm9 = vcmask 1046534  }
   0x3   :  { %v745_v7 = vpack.c.bf16 %v114_v4, %v113_v2  ;;  %v747_v8 = vpack.c.bf16 %v132_v6, %v131_v5  ;;  %v145_v9 = vld [vmem:[%s1133_s1 + $0x100] sm:$0xff]  ;;  %v146_v10 = vld [vmem:[%s1133_s1 + $0x108] sm:$0xff]  ;;  %v115_v11 = vld [vmem:[%s1133_s1 + $0x10] sm:$0xff]  ;;  %vm623_vm10 = vcmask 1047559  }
   0x4   :  { %744 = vmatprep.subr.bf16.mxu0 %v743_v3  ;;  %v775_v12 = vpack.c.bf16 %v146_v10, %v145_v9  ;;  %v116_v13 = vld [vmem:[%s1133_s1 + $0x18] sm:$0xff]  ;;  %v133_v14 = vld [vmem:[%s1133_s1 + $0xa0] sm:$0xff]  ;;  %v134_v15 = vld [vmem:[%s1133_s1 + $0xa8] sm:$0xff] }
   0x5   :  { %746 = vmatpush3.bf16.msra.mxu0 %v745_v7  ;;  %v749_v16 = vpack.c.bf16 %v116_v13, %v115_v11  ;;  %v147_v17 = vld [vmem:[%s1133_s1 + $0x110] sm:$0xff]  ;;  %v148_v18 = vld [vmem:[%s1133_s1 + $0x118] sm:$0xff]  ;;  %v751_v19 = vpack.c.bf16 %v134_v15, %v133_v14  ;;  %v117_v21 = vld [vmem:[%s1133_s1 + $0x20] sm:$0xff]  ;;  %v811_v14 = vmov 0.0  }
   0x6   :  { %748 = vmatprep.subr.bf16.mxu0 %v747_v8  ;;  %776 = vmatprep.subr.bf16.mxu1 %v775_v12  ;;  %v779_v20 = vpack.c.bf16 %v148_v18, %v147_v17  ;;  %v118_v22 = vld [vmem:[%s1133_s1 + $0x28] sm:$0xff]  ;;  %v135_v23 = vld [vmem:[%s1133_s1 + $0xb0] sm:$0xff]  ;;  %v136_v24 = vld [vmem:[%s1133_s1 + $0xb8] sm:$0xff]  ;;  %v61_v15 = vrot.slane %v811_v14, 2 }
   0x7   :  { %778 = vmatpush3.bf16.msra.mxu1 %v775_v12  ;;  %v149_v25 = vld [vmem:[%s1133_s1 + $0x120] sm:$0xff]  ;;  %v150_v26 = vld [vmem:[%s1133_s1 + $0x128] sm:$0xff]  ;;  %v753_v28 = vpack.c.bf16 %v118_v22, %v117_v21  ;;  %v151_v29 = vld [vmem:[%s1133_s1 + $0x130] sm:$0xff]  ;;  %v755_v31 = vpack.c.bf16 %v136_v24, %v135_v23 }
   0x8   :  { %780 = vmatprep.subr.bf16.mxu1 %v779_v20  ;;  %v783_v27 = vpack.c.bf16 %v150_v26, %v149_v25  ;;  %v152_v30 = vld [vmem:[%s1133_s1 + $0x138] sm:$0xff]  ;;  %v119_v32 = vld [vmem:[%s1133_s1 + $0x30] sm:$0xff]  ;;  %v137_v34 = vld [vmem:[%s1133_s1 + $0xc0] sm:$0xff] }
   0x9   :  { %750 = vmatpush3.bf16.msra.mxu0 %v749_v16  ;;  %v120_v33 = vld [vmem:[%s1133_s1 + $0x38] sm:$0xff]  ;;  %v138_v35 = vld [vmem:[%s1133_s1 + $0xc8] sm:$0xff]  ;;  %v787_v36 = vpack.c.bf16 %v152_v30, %v151_v29  ;;  %v153_v38 = vld [vmem:[%s1133_s1 + $0x140] sm:$0xff] }
   0xa   :  { %752 = vmatprep.subr.bf16.mxu0 %v751_v19  ;;  %v757_v37 = vpack.c.bf16 %v120_v33, %v119_v32  ;;  %v154_v39 = vld [vmem:[%s1133_s1 + $0x148] sm:$0xff]  ;;  %v759_v40 = vpack.c.bf16 %v138_v35, %v137_v34  ;;  %v121_v41 = vld [vmem:[%s1133_s1 + $0x40] sm:$0xff]  ;;  %v139_v43 = vld [vmem:[%s1133_s1 + $0xd0] sm:$0xff] }
   0xb   :  { %782 = vmatpush3.bf16.msra.mxu1 %v779_v20  ;;  %v122_v42 = vld [vmem:[%s1133_s1 + $0x48] sm:$0xff]  ;;  %v140_v44 = vld [vmem:[%s1133_s1 + $0xd8] sm:$0xff]  ;;  %v791_v45 = vpack.c.bf16 %v154_v39, %v153_v38  ;;  %v942_v46 = vld [vmem:[%s1134_s0] sm:$0xff] }
   0xc   :  { %784 = vmatprep.subr.bf16.mxu1 %v783_v27  ;;  %v947_v47 = vld [vmem:[%s1134_s0 + $0x8] sm:$0xff]  ;;  %v761_v48 = vpack.c.bf16 %v122_v42, %v121_v41  ;;  %v155_v49 = vld [vmem:[%s1133_s1 + $0x150] sm:$0xff]  ;;  %v156_v50 = vld [vmem:[%s1133_s1 + $0x158] sm:$0xff]  ;;  %v49_v51 = vrot.slane %v942_v46, 1  ;;  %v763_v53 = vpack.c.bf16 %v140_v44, %v139_v43  ;;  %v58_v56 = vrot.slane %v942_v46, 2 }
   0xd   :  { %754 = vmatpush3.bf16.msra.mxu0 %v753_v28  ;;  %v50_v52 = vrot.slane %v947_v47, 1  ;;  %v123_v54 = vld [vmem:[%s1133_s1 + $0x50] sm:$0xff]  ;;  %v124_v55 = vld [vmem:[%s1133_s1 + $0x58] sm:$0xff]  ;;  %v59_v57 = vrot.slane %v947_v47, 2  ;;  %v141_v58 = vld [vmem:[%s1133_s1 + $0xe0] sm:$0xff]  ;;  %v795_v62 = vpack.c.bf16 %v156_v50, %v155_v49  ;;  %v72_v32 = vrot.slane %v942_v46, 7 }
   0xe   :  { %756 = vmatprep.subr.bf16.mxu0 %v755_v31  ;;  %v142_v59 = vld [vmem:[%s1133_s1 + $0xe8] sm:$0xff]  ;;  %v74_v61 = vrot.slane %v49_v51, 7  ;;  %v77_v1 = vrot.slane %v58_v56, 7  ;;  %v765_v2 = vpack.c.bf16 %v124_v55, %v123_v54  ;;  %v157_v3 = vld [vmem:[%s1133_s1 + $0x160] sm:$0xff]  ;;  %v143_v10 = vld [vmem:[%s1133_s1 + $0xf0] sm:$0xff]  ;;  %v71_v31 = vrot.slane %v811_v14, 7 }
   0xf   :  { %786 = vmatpush3.bf16.msra.mxu1 %v783_v27  ;;  %v974_v60 = vsel %vm48_vm0, %v49_v51, %v50_v52  ;;  %v978_v0 = vsel %vm57_vm1, %v58_v56, %v59_v57  ;;  %v158_v4 = vld [vmem:[%s1133_s1 + $0x168] sm:$0xff]  ;;  %v767_v6 = vpack.c.bf16 %v142_v59, %v141_v58  ;;  %v125_v7 = vld [vmem:[%s1133_s1 + $0x60] sm:$0xff]  ;;  %v144_v11 = vld [vmem:[%s1133_s1 + $0xf8] sm:$0xff]  ;;  %v62_v29 = vsel %vm57_vm1, %v59_v57, %v61_v15 }
  0x10   :  { %788 = vmatprep.subr.bf16.mxu1 %v787_v36  ;;  %v75_v63 = vrot.slane %v974_v60, 7  ;;  %v78_v5 = vrot.slane %v978_v0, 7  ;;  %v126_v8 = vld [vmem:[%s1133_s1 + $0x68] sm:$0xff]  ;;  %v799_v13 = vpack.c.bf16 %v158_v4, %v157_v3  ;;  %v30_v16 = vld [vmem:[%s1134_s0 + $0x10] sm:$0xff]  ;;  %v31_v17 = vld [vmem:[%s1134_s0 + $0x18] sm:$0xff]  ;;  %v771_v23 = vpack.c.bf16 %v144_v11, %v143_v10 }
  0x11   :  { %758 = vmatpush3.bf16.msra.mxu0 %v757_v37  ;;  %v769_v18 = vpack.c.bf16 %v126_v8, %v125_v7  ;;  %v159_v19 = vld [vmem:[%s1133_s1 + $0x170] sm:$0xff]  ;;  %v160_v20 = vld [vmem:[%s1133_s1 + $0x178] sm:$0xff]  ;;  %v63_v21 = vrot.slane %v30_v16, 2  ;;  %v64_v22 = vrot.slane %v31_v17, 2  ;;  %v52_v26 = vrot.slane %v30_v16, 1 }
  0x12   :  { %760 = vmatprep.subr.bf16.mxu0 %v759_v40  ;;  %v76_v9 = vsel %vm70_vm2, %v74_v61, %v75_v63  ;;  %v79_v12 = vsel %vm70_vm2, %v77_v1, %v78_v5  ;;  %v127_v24 = vld [vmem:[%s1133_s1 + $0x70] sm:$0xff]  ;;  %v128_v25 = vld [vmem:[%s1133_s1 + $0x78] sm:$0xff]  ;;  %v53_v27 = vrot.slane %v31_v17, 1  ;;  %v803_v28 = vpack.c.bf16 %v160_v20, %v159_v19  ;;  %v640_v59 = vld [vmem:[%s1135_s2] ss:$0 sm:$0xff] }
  0x13   :  { %790 = vmatpush3.bf16.msra.mxu1 %v787_v36  ;;  %232 = vmatprep.mubr.f32.mxu0 %v76_v9  ;;  %v773_v30 = vpack.c.bf16 %v128_v25, %v127_v24  ;;  %v65_v33 = vsel %vm57_vm1, %v63_v21, %v64_v22  ;;  %v82_v34 = vrot.slane %v50_v52, 7  ;;  %v84_v35 = vrot.slane %v62_v29, 7 }
  0x14   :  { %792 = vmatprep.subr.bf16.mxu1 %v791_v45  ;;  %737 = vmatprep.mubr.f32.mxu1 %v79_v12  ;;  %v54_v36 = vsel %vm48_vm0, %v52_v26, %v53_v27  ;;  %v92_v37 = vrot.slane %v63_v21, 7  ;;  %v93_v38 = vrot.slane %v65_v33, 7  ;;  %v67_v39 = vsel %vm57_vm1, %v64_v22, %v61_v15 }
  0x15   :  { %762 = vmatpush3.bf16.msra.mxu0 %v761_v48  ;;  %v73_v40 = vsel %vm70_vm2, %v71_v31, %v72_v32  ;;  %v80_v41 = vrot.slane %v947_v47, 7  ;;  %v83_v42 = vsel %vm70_vm2, %v75_v63, %v82_v34  ;;  %v89_v43 = vrot.slane %v52_v26, 7 }
  0x16   :  { %764 = vmatprep.subr.bf16.mxu0 %v763_v53  ;;  %v90_v44 = vrot.slane %v54_v36, 7  ;;  %v99_v46 = vrot.slane %v67_v39, 7  ;;  %v94_v48 = vsel %vm70_vm2, %v92_v37, %v93_v38  ;;  %v87_v50 = vrot.slane %v30_v16, 7 }
  0x17   :  { %794 = vmatpush3.bf16.msra.mxu1 %v791_v45  ;;  %v85_v45 = vsel %vm70_vm2, %v78_v5, %v84_v35  ;;  %v81_v49 = vsel %vm70_vm2, %v72_v32, %v80_v41  ;;  %v97_v52 = vrot.slane %v53_v27, 7  ;;  %v95_v54 = vrot.slane %v31_v17, 7 }
  0x18   :  { %796 = vmatprep.subr.bf16.mxu1 %v795_v62  ;;  %v91_v51 = vsel %vm70_vm2, %v89_v43, %v90_v44  ;;  %v100_v47 = vsel %vm70_vm2, %v93_v38, %v99_v46  ;;  %v88_v53 = vsel %vm70_vm2, %v71_v31, %v87_v50  ;;  %v372_v46 = vlaneseq }
  0x19   :  { %766 = vmatpush3.bf16.msra.mxu0 %v765_v2  ;;  %v98_v55 = vsel %vm70_vm2, %v90_v44, %v97_v52  ;;  %v96_v56 = vsel %vm70_vm2, %v87_v50, %v95_v54  ;;  %v812_v52 = vmov 1983009808   ;;  %v369_v54 = vld [vmem:[%s1137_s4] sm:$0x1] }
  0x1a   :  { %768 = vmatprep.subr.bf16.mxu0 %v767_v6 }
  0x1b   :  { %798 = vmatpush3.bf16.msra.mxu1 %v795_v62 }
  0x1c   :  { %800 = vmatprep.subr.bf16.mxu1 %v799_v13 }
  0x1d   :  { %770 = vmatpush3.bf16.msra.mxu0 %v769_v18 }
  0x1e   :  { %772 = vmatprep.subr.bf16.mxu0 %v771_v23 }
  0x1f   :  { %802 = vmatpush3.bf16.msra.mxu1 %v799_v13 }
  0x20   :  { %804 = vmatprep.subr.bf16.mxu1 %v803_v28 }
  0x21   :  { %774 = vmatpush3.bf16.msra.mxu0 %v773_v30 }
  0x23   :  { %806 = vmatpush3.bf16.msra.mxu1 %v803_v28 }
  0x24   :  { %233 = vmatmul.mubr.f32.vlgmr.msra.gmra.mrb[0].mxu0 %v73_v40 }
  0x25   :  { %237 = vmatprep.mubr.f32.mxu0 %v83_v42 }
  0x26   :  { %738 = vmatmul.mubr.f32.vlgmr.msra.gmra.mrb[0].mxu1 %v85_v45 }
  0x27   :  { %740 = vmatprep.mubr.f32.mxu1 %v94_v48  ;;  %v373_v48 = vshrl.u32 %v372_v46, 7 }
  0x28   :  { %238 = vmatmul.mubr.f32.gmra.mrb[2].mxu0 %v81_v49  ;;  %v367_v49 = vld [vmem:[%s1136_s3] sm:$0x1] }
  0x29   :  { %242 = vmatprep.mubr.f32.mxu0 %v91_v51  ;;  %v374_v50 = vsub.s32 0, %v373_v48 }
  0x2a   :  { %741 = vmatmul.mubr.f32.gmra.mrb[2].mxu1 %v100_v47  ;;  %v400_v47 = vunpack.c.l.s4 %v812_v52 }
  0x2c   :  { %243 = vmatmul.mubr.f32.gmra.mrb[4].mxu0 %v88_v53 }
  0x2d   :  { %247 = vmatprep.mubr.f32.mxu0 %v98_v55 }
  0x30   :  { %248 = vmatmul.mubr.f32.gmra.mrb[6].mxu0 %v96_v56 }
  0xf7   :  { %v673_v57 = vpop.f32.mrb[0].mxu0 }
  0xf8   :  { %v674_v58 = vpop.f32.mrb[1].mxu0 }
  0xf9   :  { %v675_v60 = vadd.f32 %v674_v58, %v673_v57  ;;  %v739_v61 = vpop.f32.mrb[0].mxu1  ;;  %v401_v57 = vunpack.c.0.s8 %v400_v47 }
  0xfa   :  { %v319_v62 = vpop.f32.mrb[1].mxu1 }
  0xfb   :  { %v676_v63 = vpop.f32.mrb[2].mxu0  ;;  %v235_v0 = vadd.f32 %v675_v60, %v640_v59 }
  0xfc   :  { %v677_v1 = vpop.f32.mrb[3].mxu0 }
  0xfd   :  { %v678_v2 = vadd.f32 %v677_v1, %v676_v63  ;;  %v320_v3 = vadd.f32 %v319_v62, %v235_v0  ;;  %v742_v4 = vpop.f32.mrb[2].mxu1  ;;  %v404_v0 = vsub.s32 %v401_v57, %v373_v48 }
  0xfe   :  { %v329_v5 = vpop.f32.mrb[3].mxu1 }
  0xff   :  { %v240_v6 = vadd.f32 %v678_v2, %v640_v59  ;;  %v679_v7 = vpop.f32.mrb[4].mxu0  ;;  %v348_v12 = vmul.f32 %v320_v3, %v320_v3 }
 0x100   :  { %v680_v8 = vpop.f32.mrb[5].mxu0 }
 0x101   :  { %v325_v9 = vadd.f32 %v739_v61, %v240_v6  ;;  %v681_v10 = vadd.f32 %v680_v8, %v679_v7 }
 0x103   :  { %v338_v11 = vadd.f32 %v325_v9, %v320_v3  ;;  %v349_v13 = vmul.f32 %v325_v9, %v325_v9  ;;  %v682_v14 = vpop.f32.mrb[6].mxu0  ;;  %v245_v15 = vadd.f32 %v681_v10, %v640_v59 }
 0x104   :  { %v683_v16 = vpop.f32.mrb[7].mxu0 }
 0x105   :  { %v352_v17 = vadd.f32 %v349_v13, %v348_v12  ;;  %v684_v18 = vadd.f32 %v683_v16, %v682_v14  ;;  %v330_v19 = vadd.f32 %v329_v5, %v245_v15 }
 0x107   :  { %v250_v20 = vadd.f32 %v684_v18, %v640_v59  ;;  %v339_v21 = vadd.f32 %v338_v11, %v330_v19  ;;  %v350_v22 = vmul.f32 %v330_v19, %v330_v19 }
 0x109   :  { %v335_v23 = vadd.f32 %v742_v4, %v250_v20  ;;  %v353_v24 = vadd.f32 %v352_v17, %v350_v22 }
 0x10b   :  { %v351_v25 = vmul.f32 %v335_v23, %v335_v23  ;;  %v340_v26 = vadd.f32 %v339_v21, %v335_v23 }
 0x10d   :  { %v341_v27 = vrot.slane %v340_v26, 4  ;;  %v354_v28 = vadd.f32 %v353_v24, %v351_v25 }
 0x10f   :  { %v342_v29 = vadd.f32 %v341_v27, %v340_v26  ;;  %v355_v30 = vrot.slane %v354_v28, 4 }
 0x111   :  { %v343_v31 = vrot.slane %v342_v29, 2  ;;  %v356_v32 = vadd.f32 %v355_v30, %v354_v28 }
 0x113   :  { %v344_v33 = vadd.f32 %v343_v31, %v342_v29  ;;  %v357_v34 = vrot.slane %v356_v32, 2 }
 0x115   :  { %v345_v35 = vrot.slane %v344_v33, 1  ;;  %v358_v36 = vadd.f32 %v357_v34, %v356_v32 }
 0x117   :  { %v346_v37 = vadd.f32 %v345_v35, %v344_v33  ;;  %v359_v38 = vrot.slane %v358_v36, 1 }
 0x119   :  { %v347_v39 = vmul.f32 0.03125, %v346_v37  ;;  %v360_v40 = vadd.f32 %v359_v38, %v358_v36 }
 0x11b   :  { %v361_v41 = vmul.f32 0.03125, %v360_v40  ;;  %v362_v42 = vmul.f32 %v347_v39, %v347_v39 }
 0x11d   :  { %v363_v43 = vsub.f32 %v361_v41, %v362_v42 }
 0x11f   :  { %v364_v44 = vmax.f32 %v363_v43, 0.0 }
 0x121   :  { %v365_v45 = vadd.f32 1e-05, %v364_v44 }
 0x123   :  { %809 = vrsqrt.f32 %v365_v45 }
 0x12d   :  { %v810_v51 = vpop.eup %809 }
 0x12e   :  { %v368_v53 = vmul.f32 %v810_v51, %v367_v49 }
 0x130   :  { %v370_v55 = vmul.f32 %v368_v53, %v347_v39  ;;  %v375_v56 = vrot.slane %v368_v53, %v374_v50 }
 0x132   :  { %v371_v58 = vsub.f32 %v369_v54, %v370_v55  ;;  %v376_v59 = vmul.f32 %v375_v56, %v320_v3  ;;  %v377_v60 = vmul.f32 %v375_v56, %v325_v9  ;;  %v378_v61 = vmul.f32 %v375_v56, %v330_v19 }
 0x133   :  { %v379_v62 = vmul.f32 %v375_v56, %v335_v23 }
 0x134   :  { %v384_v63 = vrot.slane %v371_v58, %v374_v50 }
 0x136   :  { %v386_v1 = vadd.f32 %v384_v63, %v376_v59  ;;  %v387_v2 = vadd.f32 %v384_v63, %v377_v60  ;;  %v388_v4 = vadd.f32 %v384_v63, %v378_v61  ;;  %v389_v5 = vadd.f32 %v384_v63, %v379_v62 }
 0x138   :  { %v390_v6 = vmax.f32 %v386_v1, 0.0  ;;  %v391_v7 = vmax.f32 %v387_v2, 0.0  ;;  %v392_v8 = vmax.f32 %v388_v4, 0.0  ;;  %v393_v10 = vmax.f32 %v389_v5, 0.0 }
 0x13a   :  { %v398_v11 = vcombine.high %v390_v6, %v390_v6  ;;  %v405_v12 = vrot.slane %v390_v6, %v404_v0  ;;  %v415_v13 = vcombine.high %v391_v7, %v391_v7  ;;  %v422_v14 = vrot.slane %v391_v7, %v404_v0 }
 0x13b   :  { %v432_v15 = vcombine.high %v392_v8, %v392_v8  ;;  %v1046_v3 = vrot.slane %v392_v8, %v404_v0  ;;  %v449_v9 = vcombine.high %v393_v10, %v393_v10  ;;  %v1048_v16 = vrot.slane %v393_v10, %v404_v0 }
 0x13c   :  { %v412_v17 = vrot.slane %v398_v11, %v404_v0  ;;  %v413_v18 = vcombine.high %v405_v12, %v405_v12  ;;  %v429_v19 = vrot.slane %v415_v13, %v404_v0  ;;  %v430_v20 = vcombine.high %v422_v14, %v422_v14 }
 0x13d   :  { %v1050_v21 = vrot.slane %v432_v15, %v404_v0  ;;  %v447_v22 = vcombine.high %v1046_v3, %v1046_v3  ;;  %v483_v25 = vsel %vm482_vm3, %v405_v12, -inf  ;;  %v1056_v27 = vrot.slane %v449_v9, %v404_v0 }
 0x13e   :  { %v414_v23 = vcombine.high %v412_v17, %v412_v17  ;;  %v431_v24 = vcombine.high %v429_v19, %v429_v19  ;;  %v490_v26 = vsel %vm482_vm3, %v413_v18, -inf  ;;  %v464_v28 = vcombine.high %v1048_v16, %v1048_v16 }
 0x13f   :  { %v484_v29 = vrot.slane %v483_v25, 4  ;;  %v491_v30 = vrot.slane %v490_v26, 4  ;;  %v497_v31 = vsel %vm482_vm3, %v412_v17, -inf  ;;  %v511_v33 = vsel %vm482_vm3, %v422_v14, -inf }
 0x140   :  { %v504_v32 = vsel %vm482_vm3, %v414_v23, -inf  ;;  %v518_v34 = vsel %vm482_vm3, %v430_v20, -inf  ;;  %v498_v37 = vrot.slane %v497_v31, 4  ;;  %v512_v39 = vrot.slane %v511_v33, 4 }
 0x141   :  { %v485_v35 = vmax.f32 %v483_v25, %v484_v29  ;;  %v492_v36 = vmax.f32 %v490_v26, %v491_v30  ;;  %v505_v38 = vrot.slane %v504_v32, 4  ;;  %v519_v40 = vrot.slane %v518_v34, 4 }
 0x142   :  { %v525_v41 = vsel %vm482_vm3, %v429_v19, -inf  ;;  %v532_v42 = vsel %vm482_vm3, %v431_v24, -inf  ;;  %v499_v45 = vmax.f32 %v497_v31, %v498_v37  ;;  %v513_v48 = vmax.f32 %v511_v33, %v512_v39 }
 0x143   :  { %v486_v43 = vrot.slane %v485_v35, 2  ;;  %v493_v44 = vrot.slane %v492_v36, 2  ;;  %v506_v46 = vmax.f32 %v504_v32, %v505_v38  ;;  %v520_v49 = vmax.f32 %v518_v34, %v519_v40 }
 0x144   :  { %v526_v50 = vrot.slane %v525_v41, 4  ;;  %v533_v51 = vrot.slane %v532_v42, 4  ;;  %v500_v53 = vrot.slane %v499_v45, 2  ;;  %v514_v55 = vrot.slane %v513_v48, 2 }
 0x145   :  { %v487_v52 = vmax.f32 %v485_v35, %v486_v43  ;;  %v494_v47 = vmax.f32 %v492_v36, %v493_v44  ;;  %v507_v54 = vrot.slane %v506_v46, 2  ;;  %v521_v56 = vrot.slane %v520_v49, 2 }
 0x146   :  { %v527_v57 = vmax.f32 %v525_v41, %v526_v50  ;;  %v534_v58 = vmax.f32 %v532_v42, %v533_v51  ;;  %v501_v61 = vmax.f32 %v499_v45, %v500_v53  ;;  %v515_v63 = vmax.f32 %v513_v48, %v514_v55 }
 0x147   :  { %v488_v59 = vrot.slane %v487_v52, 1  ;;  %v495_v60 = vrot.slane %v494_v47, 1  ;;  %v508_v62 = vmax.f32 %v506_v46, %v507_v54  ;;  %v522_v0 = vmax.f32 %v520_v49, %v521_v56 }
 0x148   :  { %v528_v1 = vrot.slane %v527_v57, 2  ;;  %v535_v2 = vrot.slane %v534_v58, 2  ;;  %v448_v4 = vcombine.high %v1050_v21, %v1050_v21  ;;  %v465_v5 = vcombine.high %v1056_v27, %v1056_v27 }
 0x149   :  { %v502_v6 = vrot.slane %v501_v61, 1  ;;  %v509_v7 = vrot.slane %v508_v62, 1  ;;  %v516_v8 = vrot.slane %v515_v63, 1  ;;  %v523_v10 = vrot.slane %v522_v0, 1 }
 0x14a   :  { %v1070_v11 = vmax.f32 %v527_v57, %v528_v1  ;;  %v1072_v12 = vmax.f32 %v534_v58, %v535_v2  ;;  %v1074_v13 = vmax.f32 %v487_v52, %v488_v59  ;;  %v1076_v14 = vmax.f32 %v494_v47, %v495_v60 }
 0x14b   :  { %v539_v15 = vsel %vm482_vm3, %v1046_v3, -inf  ;;  %v546_v9 = vsel %vm482_vm3, %v447_v22, -inf  ;;  %v1081_v17 = vmax.f32 %v501_v61, %v502_v6  ;;  %v1083_v18 = vmax.f32 %v508_v62, %v509_v7 }
 0x14c   :  { %v1085_v19 = vmax.f32 %v515_v63, %v516_v8  ;;  %v1087_v20 = vmax.f32 %v522_v0, %v523_v10  ;;  %v540_v23 = vrot.slane %v539_v15, 4  ;;  %v547_v24 = vrot.slane %v546_v9, 4 }
 0x14d   :  { %v553_v25 = vsel %vm482_vm3, %v1050_v21, -inf  ;;  %v560_v26 = vsel %vm482_vm3, %v448_v4, -inf  ;;  %v530_v29 = vrot.slane %v1070_v11, 1  ;;  %v537_v3 = vrot.slane %v1072_v12, 1 }
 0x14e   :  { %v554_v22 = vrot.slane %v553_v25, 4  ;;  %v561_v30 = vrot.slane %v560_v26, 4  ;;  %v541_v31 = vmax.f32 %v539_v15, %v540_v23  ;;  %v548_v32 = vmax.f32 %v546_v9, %v547_v24 }
 0x14f   :  { %v567_v33 = vsel %vm482_vm3, %v1048_v16, -inf  ;;  %v574_v34 = vsel %vm482_vm3, %v464_v28, -inf  ;;  %v581_v40 = vsel %vm482_vm3, %v1056_v27, -inf  ;;  %v588_v41 = vsel %vm482_vm3, %v465_v5, -inf }
 0x150   :  { %v555_v21 = vmax.f32 %v553_v25, %v554_v22  ;;  %v562_v35 = vmax.f32 %v560_v26, %v561_v30  ;;  %v568_v36 = vrot.slane %v567_v33, 4  ;;  %v575_v37 = vrot.slane %v574_v34, 4 }
 0x151   :  { %v542_v38 = vrot.slane %v541_v31, 2  ;;  %v549_v39 = vrot.slane %v548_v32, 2  ;;  %v582_v46 = vrot.slane %v581_v40, 4  ;;  %v589_v48 = vrot.slane %v588_v41, 4 }
 0x152   :  { %v556_v42 = vrot.slane %v555_v21, 2  ;;  %v563_v43 = vrot.slane %v562_v35, 2  ;;  %v569_v44 = vmax.f32 %v567_v33, %v568_v36  ;;  %v576_v16 = vmax.f32 %v574_v34, %v575_v37 }
 0x153   :  { %v543_v28 = vmax.f32 %v541_v31, %v542_v38  ;;  %v550_v45 = vmax.f32 %v548_v32, %v549_v39  ;;  %v583_v27 = vmax.f32 %v581_v40, %v582_v46  ;;  %v590_v54 = vmax.f32 %v588_v41, %v589_v48 }
 0x154   :  { %v557_v49 = vmax.f32 %v555_v21, %v556_v42  ;;  %v564_v50 = vmax.f32 %v562_v35, %v563_v43  ;;  %v570_v51 = vrot.slane %v569_v44, 2  ;;  %v577_v52 = vrot.slane %v576_v16, 2 }
 0x155   :  { %v544_v47 = vrot.slane %v543_v28, 1  ;;  %v551_v53 = vrot.slane %v550_v45, 1  ;;  %v584_v61 = vrot.slane %v583_v27, 2  ;;  %v591_v62 = vrot.slane %v590_v54, 2 }
 0x156   :  { %v558_v55 = vrot.slane %v557_v49, 1  ;;  %v565_v56 = vrot.slane %v564_v50, 1  ;;  %v571_v57 = vmax.f32 %v569_v44, %v570_v51  ;;  %v578_v58 = vmax.f32 %v576_v16, %v577_v52 }
 0x157   :  { %v545_v59 = vmax.f32 %v543_v28, %v544_v47  ;;  %v552_v60 = vmax.f32 %v550_v45, %v551_v53  ;;  %v585_v4 = vmax.f32 %v583_v27, %v584_v61  ;;  %v592_v5 = vmax.f32 %v590_v54, %v591_v62 }
 0x158   :  { %v559_v63 = vmax.f32 %v557_v49, %v558_v55  ;;  %v566_v0 = vmax.f32 %v564_v50, %v565_v56  ;;  %v572_v1 = vrot.slane %v571_v57, 1  ;;  %v579_v2 = vrot.slane %v578_v58, 1 }
 0x159   :  { %v612_v6 = vsel %vm611_vm4, %v1076_v14, %v1074_v13  ;;  %v625_v7 = vsel %vm611_vm4, %v552_v60, %v545_v59  ;;  %v586_v23 = vrot.slane %v585_v4, 1  ;;  %v593_v24 = vrot.slane %v592_v5, 1 }
 0x15a   :  { %v573_v8 = vmax.f32 %v571_v57, %v572_v1  ;;  %v580_v10 = vmax.f32 %v578_v58, %v579_v2  ;;  %v614_v15 = vsel %vm613_vm5, %v1081_v17, %v612_v6  ;;  %v626_v9 = vsel %vm613_vm5, %v559_v63, %v625_v7 }
 0x15b   :  { %v616_v25 = vsel %vm615_vm6, %v1083_v18, %v614_v15  ;;  %v627_v26 = vsel %vm615_vm6, %v566_v0, %v626_v9  ;;  %v531_v13 = vmax.f32 %v1070_v11, %v530_v29  ;;  %v538_v17 = vmax.f32 %v1072_v12, %v537_v3 }
 0x15c   :  { %v618_v14 = vsel %vm617_vm7, %v1085_v19, %v616_v25  ;;  %v628_v22 = vsel %vm617_vm7, %v573_v8, %v627_v26  ;;  %v587_v30 = vmax.f32 %v585_v4, %v586_v23  ;;  %v594_v32 = vmax.f32 %v592_v5, %v593_v24 }
 0x15d   :  { %v620_v18 = vsel %vm619_vm8, %v1087_v20, %v618_v14  ;;  %v629_v31 = vsel %vm619_vm8, %v580_v10, %v628_v22 }
 0x15e   :  { %v622_v33 = vsel %vm621_vm9, %v531_v13, %v620_v18  ;;  %v630_v29 = vsel %vm621_vm9, %v587_v30, %v629_v31 }
 0x15f   :  { %v624_v11 = vsel %vm623_vm10, %v538_v17, %v622_v33  ;;  %v631_v19 = vsel %vm623_vm10, %v594_v32, %v630_v29 }
 0x160   :  { %634 = vst [vmem:[%s1138_s5] sm:$0xff] %v624_v11  ;;  %635 = vst [vmem:[%s1138_s5 + $0x8] sm:$0xff] %v631_v19 }

</bundles_post_ra>
